<compile_context>
chip_gen: v5e
topology: v5e:2x2
jax: 0.10.0
libtpu: 0.0.40
codegen_flags: <defaults>
</compile_context>

<pallas_src>
import functools

import jax
import jax.numpy as jnp
from jax.experimental import pallas as pl
from jax.experimental.pallas import tpu as pltpu

NEG_SLOPE = 0.2


# --------------------------------------------------------------------------
# Chip-dependent tiling / VMEM budget, decided once at import time.
# --------------------------------------------------------------------------
def _chip_kind():
    try:
        return jax.devices()[0].device_kind.lower()
    except Exception:
        return ""


_KIND = _chip_kind()
if "v7" in _KIND:
    # v7x: 64 MiB VMEM per TensorCore, 2 TensorCores per chip.
    _MAX_TN = 1024
    _VMEM_LIMIT = 56 * 1024 * 1024
    _CORE_SPLIT = 2
else:
    # v5e / v6e (and default): 128 MiB physical VMEM, 1 TensorCore per chip.
    _MAX_TN = 2048
    _VMEM_LIMIT = 100 * 1024 * 1024
    _CORE_SPLIT = 1


def _probe_resident_vmem_specs():
    """Import-time feature check: unblocked (whole-array) VMEM input specs."""
    try:
        def _k(w_ref, o_ref):
            o_ref[...] = w_ref[...] * 2.0

        fn = pl.pallas_call(
            _k,
            out_shape=jax.ShapeDtypeStruct((8, 128), jnp.float32),
            grid=(1,),
            in_specs=[pl.BlockSpec(memory_space=pltpu.MemorySpace.VMEM)],
            out_specs=pl.BlockSpec((8, 128), lambda i: (0, 0)),
        )
        jax.jit(fn).lower(jax.ShapeDtypeStruct((8, 128), jnp.float32))
        return True
    except Exception:
        return False


_RESIDENT_WEIGHTS = _probe_resident_vmem_specs()


# --------------------------------------------------------------------------
# Kernel
# --------------------------------------------------------------------------
def _disc_pool_kernel(x_ref, *refs, layer_num, first_layer_vpu):
    """Fused 1x1-conv stack + LeakyReLU(0.2) + running max over vertices.

    refs = conv_w_refs[layer_num] + conv_b_refs[layer_num] + (o_ref,)
      x_ref : (TN, C0) f32 chunk of vertices for one batch element
      o_ref : (1, C_last) f32, resident across the vertex-chunk grid axis
    """
    conv_ws = refs[:layer_num]
    conv_bs = refs[layer_num:2 * layer_num]
    o_ref = refs[2 * layer_num]

    n = pl.program_id(2)  # vertex-chunk (reduction) axis

    # In-kernel bf16 cast: hidden under the MXU work, avoids a separate
    # wrapper-side HBM round trip on the input.
    x = x_ref[...].astype(jnp.bfloat16)

    start = 0
    if first_layer_vpu:
        # C0 is tiny (e.g. 3): a K=3 contraction would be padded to the full
        # MXU depth (~1-2% utilization).  Do it on the otherwise-idle VPU as
        # C0 broadcast FMAs, with the bias folded into the accumulator init.
        c0 = x.shape[-1]
        xf = x.astype(jnp.float32)
        wf = conv_ws[0][...].astype(jnp.float32)
        acts = conv_bs[0][...] + xf[:, 0:1] * wf[0:1, :]
        for j in range(1, c0):
            acts = acts + xf[:, j:j + 1] * wf[j:j + 1, :]
        acts = jnp.maximum(acts, NEG_SLOPE * acts)              # LeakyReLU
        x = acts.astype(jnp.bfloat16) if layer_num > 1 else acts
        start = 1

    for i in range(start, layer_num):
        acts = jnp.dot(x, conv_ws[i][...],
                       preferred_element_type=jnp.float32)      # MXU, f32 accum
        acts = acts + conv_bs[i][...]
        acts = jnp.maximum(acts, NEG_SLOPE * acts)               # LeakyReLU
        # Keep bf16 operands feeding the MXU; last layer stays f32 for pooling.
        x = acts.astype(jnp.bfloat16) if i + 1 < layer_num else acts

    chunk_max = jnp.max(x, axis=0, keepdims=True)                # (1, C_last)

    @pl.when(n == 0)
    def _():
        o_ref[...] = jnp.full(o_ref.shape, -jnp.inf, dtype=o_ref.dtype)

    # Single unconditional max-store path (resident accumulator).
    o_ref[...] = jnp.maximum(o_ref[...], chunk_max)


def _pick_vertex_chunk(n, max_tn):
    for tn in (2048, 1024, 512, 256, 128):
        if tn <= max_tn and n % tn == 0:
            return tn
    return n  # small / irregular N: single full-extent chunk


# --------------------------------------------------------------------------
# Wrapper (jit-friendly: no host syncs, no runtime fallback)
# --------------------------------------------------------------------------
def discriminator_forward(f, conv_ws, conv_bs, fin_ws, fin_bs, *,
                          vertex_chunk=None):
    """f: (B, N, C0) float32 (channels-last PyTorch input, pre-transpose).

    Returns (B, 1) float32.
    """
    B, N, C0 = f.shape
    layer_num = len(conv_ws)
    c_last = conv_ws[-1].shape[1]

    tn = vertex_chunk if vertex_chunk is not None else _pick_vertex_chunk(N, _MAX_TN)
    n_chunks = N // tn
    assert n_chunks * tn == N, (N, tn)

    # Split the vertex reduction across TensorCores (v7x) when the batch axis
    # alone can't keep both cores busy.
    split = _CORE_SPLIT if (_CORE_SPLIT > 1 and n_chunks % _CORE_SPLIT == 0) else 1
    cps = n_chunks // split  # chunks per split

    # bf16 weight operands (native MXU); biases and accumulation stay f32.
    ws_bf = [w.astype(jnp.bfloat16) for w in conv_ws]
    bs_f32 = [b.astype(jnp.float32) for b in conv_bs]

    first_layer_vpu = C0 <= 8
    kernel = functools.partial(_disc_pool_kernel, layer_num=layer_num,
                               first_layer_vpu=first_layer_vpu)

    x_spec = pl.BlockSpec((None, tn, C0), lambda b, s, n: (b, s * cps + n, 0))
    out_spec = pl.BlockSpec((None, None, 1, c_last),
                            lambda b, s, n: (b, s, 0, 0))

    if _RESIDENT_WEIGHTS:
        # Whole weight/bias arrays resident in VMEM for the entire grid:
        # single-buffered, no 2x double-buffer VMEM cost.
        wb_specs = [pl.BlockSpec(memory_space=pltpu.MemorySpace.VMEM)
                    for _ in range(2 * layer_num)]
    else:
        # Portable fallback: constant-index-map blocked specs (block revisited
        # every step so no re-DMA; only costs the extra buffer).
        wb_specs = [pl.BlockSpec(a.shape, lambda b, s, n: (0, 0))
                    for a in (*ws_bf, *bs_f32)]

    flops = 2 * B * N * sum(w.shape[0] * w.shape[1] for w in conv_ws)
    bytes_accessed = (f.size * 4
                      + sum(w.size * 2 for w in ws_bf)
                      + sum(b.size * 4 for b in bs_f32)
                      + B * split * c_last * 4)
    cost = pl.CostEstimate(flops=flops, transcendentals=0,
                           bytes_accessed=bytes_accessed)

    pooled = pl.pallas_call(
        kernel,
        out_shape=jax.ShapeDtypeStruct((B, split, 1, c_last), jnp.float32),
        grid=(B, split, cps),
        in_specs=[x_spec] + wb_specs,
        out_specs=out_spec,
        compiler_params=pltpu.CompilerParams(
            # batch and core-split axes shard across TensorCores; the
            # vertex-chunk axis is the pooling reduction -> arbitrary (last).
            dimension_semantics=("parallel", "parallel", "arbitrary"),
            vmem_limit_bytes=_VMEM_LIMIT),
        cost_estimate=cost,
    )(f, *ws_bf, *bs_f32)

    pooled = jnp.max(pooled, axis=1).reshape(B, c_last)

    # Final 3 Linears as plain batched XLA matmuls (full MXU utilization; keeps
    # their weights out of resident VMEM and fuses bias adds under jit).
    # TODO(synk): on v7x the two widest conv weights could be fp8 for ~2x MXU
    # throughput; skipped to keep the bf16/f32 precision contract.
    out = pooled
    for w, b in zip(fin_ws, fin_bs):
        out = jnp.dot(out, w, preferred_element_type=jnp.float32) + b
    return out


def discriminator_ref(f, conv_ws, conv_bs, fin_ws, fin_bs):
    """Pure-JAX reference mirroring the kernel's precision contract:
    bf16 conv operands, f32 accumulation, exact max, f32 final linears."""
    layer_num = len(conv_ws)
    x = f.astype(jnp.bfloat16)
    for i, (w, b) in enumerate(zip(conv_ws, conv_bs)):
        acts = jnp.einsum("bnc,cd->bnd", x, w.astype(jnp.bfloat16),
                          preferred_element_type=jnp.float32) + b
        acts = jnp.maximum(acts, NEG_SLOPE * acts)
        x = acts.astype(jnp.bfloat16) if i + 1 < layer_num else acts
    out = jnp.max(x, axis=1)                                   # (B, C_last) f32
    for w, b in zip(fin_ws, fin_bs):
        out = jnp.dot(out, w, preferred_element_type=jnp.float32) + b
    return out


if __name__ == "__main__":
    # Small-scale variant of the default features=[3, 64, 128, 256, 512, 1024, 2048]:
    # same structure (6 conv1d layers + 3 final linears), reduced widths.
    features = [3, 16, 32, 64, 128, 256, 512]
    B, N = 2, 512
    layer_num = len(features) - 1

    key = jax.random.PRNGKey(0)
    k = key

    conv_ws, conv_bs = [], []
    for i in range(layer_num):
        k, k1, k2 = jax.random.split(k, 3)
        fan_in = features[i]
        conv_ws.append(jax.random.normal(
            k1, (features[i], features[i + 1]), jnp.float32) / jnp.sqrt(fan_in))
        conv_bs.append(jax.random.normal(
            k2, (1, features[i + 1]), jnp.float32) * 0.01)

    # final_layer: Linear(feat[-1]->feat[-3]) -> Linear(->feat[-5]) -> Linear(->1)
    fin_dims = [features[-1], features[-3], features[-5], 1]
    fin_ws, fin_bs = [], []
    for i in range(3):
        k, k1, k2 = jax.random.split(k, 3)
        fan_in = fin_dims[i]
        fin_ws.append(jax.random.normal(
            k1, (fin_dims[i], fin_dims[i + 1]), jnp.float32) / jnp.sqrt(fan_in))
        fin_bs.append(jax.random.normal(
            k2, (1, fin_dims[i + 1]), jnp.float32) * 0.01)

    k, kx = jax.random.split(k)
    f = jax.random.normal(kx, (B, N, features[0]), jnp.float32)

    # vertex_chunk=128 -> 4 chunks so the running-max reduction axis (and on
    # v7x the core-split axis) is exercised even at this small N.
    fwd = jax.jit(functools.partial(discriminator_forward, vertex_chunk=128))
    out = jax.block_until_ready(fwd(f, conv_ws, conv_bs, fin_ws, fin_bs))

    ref = jax.block_until_ready(
        discriminator_ref(f, conv_ws, conv_bs, fin_ws, fin_bs))

    assert out.shape == (B, 1), out.shape
    assert jnp.allclose(out, ref, rtol=2e-2, atol=2e-2), (out, ref)
    print("KERNEL_OK")
</pallas_src>

<mosaic_0001>
module attributes {stable_mosaic.version = 11 : i64} {
  func.func @_disc_pool_kernel(%arg0: i32, %arg1: i32, %arg2: i32, %arg3: memref<1x128x3xf32, #tpu.memory_space<vmem>>, %arg4: memref<3x16xbf16, #tpu.memory_space<vmem>>, %arg5: memref<16x32xbf16, #tpu.memory_space<vmem>>, %arg6: memref<32x64xbf16, #tpu.memory_space<vmem>>, %arg7: memref<64x128xbf16, #tpu.memory_space<vmem>>, %arg8: memref<128x256xbf16, #tpu.memory_space<vmem>>, %arg9: memref<256x512xbf16, #tpu.memory_space<vmem>>, %arg10: memref<1x16xf32, #tpu.memory_space<vmem>>, %arg11: memref<1x32xf32, #tpu.memory_space<vmem>>, %arg12: memref<1x64xf32, #tpu.memory_space<vmem>>, %arg13: memref<1x128xf32, #tpu.memory_space<vmem>>, %arg14: memref<1x256xf32, #tpu.memory_space<vmem>>, %arg15: memref<1x512xf32, #tpu.memory_space<vmem>>, %arg16: memref<1x1x1x512xf32, #tpu.memory_space<vmem>>) attributes {dimension_semantics = [#tpu.dimension_semantics<parallel>, #tpu.dimension_semantics<parallel>, #tpu.dimension_semantics<arbitrary>], iteration_bounds = array<i64: 2, 1, 4>, scalar_prefetch = 0 : i64, scratch_operands = 0 : i64, tpu.core_type = #tpu.core_type<tc>, window_params = [{transform_indices = @transform_0, window_bounds = array<i64: 1, 128, 3>}, {pipeline_mode = #tpu.pipeline_mode<synchronous>, transform_indices = @transform_1, window_bounds = array<i64: 3, 16>}, {pipeline_mode = #tpu.pipeline_mode<synchronous>, transform_indices = @transform_2, window_bounds = array<i64: 16, 32>}, {pipeline_mode = #tpu.pipeline_mode<synchronous>, transform_indices = @transform_3, window_bounds = array<i64: 32, 64>}, {pipeline_mode = #tpu.pipeline_mode<synchronous>, transform_indices = @transform_4, window_bounds = array<i64: 64, 128>}, {pipeline_mode = #tpu.pipeline_mode<synchronous>, transform_indices = @transform_5, window_bounds = array<i64: 128, 256>}, {pipeline_mode = #tpu.pipeline_mode<synchronous>, transform_indices = @transform_6, window_bounds = array<i64: 256, 512>}, {pipeline_mode = #tpu.pipeline_mode<synchronous>, transform_indices = @transform_7, window_bounds = array<i64: 1, 16>}, {pipeline_mode = #tpu.pipeline_mode<synchronous>, transform_indices = @transform_8, window_bounds = array<i64: 1, 32>}, {pipeline_mode = #tpu.pipeline_mode<synchronous>, transform_indices = @transform_9, window_bounds = array<i64: 1, 64>}, {pipeline_mode = #tpu.pipeline_mode<synchronous>, transform_indices = @transform_10, window_bounds = array<i64: 1, 128>}, {pipeline_mode = #tpu.pipeline_mode<synchronous>, transform_indices = @transform_11, window_bounds = array<i64: 1, 256>}, {pipeline_mode = #tpu.pipeline_mode<synchronous>, transform_indices = @transform_12, window_bounds = array<i64: 1, 512>}, {transform_indices = @transform_13, window_bounds = array<i64: 1, 1, 1, 512>}]} {
    %c0 = arith.constant 0 : index
    %c0_0 = arith.constant 0 : index
    %c0_1 = arith.constant 0 : index
    %0 = vector.load %arg3[%c0, %c0_0, %c0_1] : memref<1x128x3xf32, #tpu.memory_space<vmem>>, vector<1x128x3xf32>
    %1 = vector.shape_cast %0 : vector<1x128x3xf32> to vector<128x3xf32>
    %2 = arith.truncf %1 : vector<128x3xf32> to vector<128x3xbf16>
    %3 = arith.extf %2 : vector<128x3xbf16> to vector<128x3xf32>
    %c0_2 = arith.constant 0 : index
    %c0_3 = arith.constant 0 : index
    %4 = vector.load %arg4[%c0_2, %c0_3] : memref<3x16xbf16, #tpu.memory_space<vmem>>, vector<3x16xbf16>
    %5 = arith.extf %4 : vector<3x16xbf16> to vector<3x16xf32>
    %c0_4 = arith.constant 0 : index
    %c0_5 = arith.constant 0 : index
    %6 = vector.load %arg10[%c0_4, %c0_5] : memref<1x16xf32, #tpu.memory_space<vmem>>, vector<1x16xf32>
    %7 = vector.extract_strided_slice %3 {offsets = [0, 0], sizes = [128, 1], strides = [1, 1]} : vector<128x3xf32> to vector<128x1xf32>
    %8 = vector.extract_strided_slice %5 {offsets = [0, 0], sizes = [1, 16], strides = [1, 1]} : vector<3x16xf32> to vector<1x16xf32>
    %9 = vector.broadcast %7 : vector<128x1xf32> to vector<128x16xf32>
    %10 = vector.broadcast %8 : vector<1x16xf32> to vector<128x16xf32>
    %11 = arith.mulf %9, %10 : vector<128x16xf32>
    %12 = vector.broadcast %6 : vector<1x16xf32> to vector<128x16xf32>
    %13 = arith.addf %12, %11 : vector<128x16xf32>
    %14 = vector.extract_strided_slice %3 {offsets = [0, 1], sizes = [128, 1], strides = [1, 1]} : vector<128x3xf32> to vector<128x1xf32>
    %15 = vector.extract_strided_slice %5 {offsets = [1, 0], sizes = [1, 16], strides = [1, 1]} : vector<3x16xf32> to vector<1x16xf32>
    %16 = vector.broadcast %14 : vector<128x1xf32> to vector<128x16xf32>
    %17 = vector.broadcast %15 : vector<1x16xf32> to vector<128x16xf32>
    %18 = arith.mulf %16, %17 : vector<128x16xf32>
    %19 = arith.addf %13, %18 : vector<128x16xf32>
    %20 = vector.extract_strided_slice %3 {offsets = [0, 2], sizes = [128, 1], strides = [1, 1]} : vector<128x3xf32> to vector<128x1xf32>
    %21 = vector.extract_strided_slice %5 {offsets = [2, 0], sizes = [1, 16], strides = [1, 1]} : vector<3x16xf32> to vector<1x16xf32>
    %22 = vector.broadcast %20 : vector<128x1xf32> to vector<128x16xf32>
    %23 = vector.broadcast %21 : vector<1x16xf32> to vector<128x16xf32>
    %24 = arith.mulf %22, %23 : vector<128x16xf32>
    %25 = arith.addf %19, %24 : vector<128x16xf32>
    %cst = arith.constant 2.000000e-01 : f32
    %26 = vector.broadcast %cst : f32 to vector<128x16xf32>
    %27 = arith.mulf %26, %25 : vector<128x16xf32>
    %28 = arith.maximumf %25, %27 : vector<128x16xf32>
    %29 = arith.truncf %28 : vector<128x16xf32> to vector<128x16xbf16>
    %c0_6 = arith.constant 0 : index
    %c0_7 = arith.constant 0 : index
    %30 = vector.load %arg5[%c0_6, %c0_7] : memref<16x32xbf16, #tpu.memory_space<vmem>>, vector<16x32xbf16>
    %cst_8 = arith.constant dense<0.000000e+00> : vector<128x32xf32>
    %31 = tpu.matmul %29, %30, %cst_8 {dimension_numbers = #tpu.dot_dimension_numbers<[1], [0], [0], [1], [0, 0, 1, 1], [], []>} : vector<128x16xbf16>, vector<16x32xbf16>, vector<128x32xf32> -> vector<128x32xf32>
    %c0_9 = arith.constant 0 : index
    %c0_10 = arith.constant 0 : index
    %32 = vector.load %arg11[%c0_9, %c0_10] : memref<1x32xf32, #tpu.memory_space<vmem>>, vector<1x32xf32>
    %33 = vector.broadcast %32 : vector<1x32xf32> to vector<128x32xf32>
    %34 = arith.addf %31, %33 : vector<128x32xf32>
    %cst_11 = arith.constant 2.000000e-01 : f32
    %35 = vector.broadcast %cst_11 : f32 to vector<128x32xf32>
    %36 = arith.mulf %35, %34 : vector<128x32xf32>
    %37 = arith.maximumf %34, %36 : vector<128x32xf32>
    %38 = arith.truncf %37 : vector<128x32xf32> to vector<128x32xbf16>
    %c0_12 = arith.constant 0 : index
    %c0_13 = arith.constant 0 : index
    %39 = vector.load %arg6[%c0_12, %c0_13] : memref<32x64xbf16, #tpu.memory_space<vmem>>, vector<32x64xbf16>
    %cst_14 = arith.constant dense<0.000000e+00> : vector<128x64xf32>
    %40 = tpu.matmul %38, %39, %cst_14 {dimension_numbers = #tpu.dot_dimension_numbers<[1], [0], [0], [1], [0, 0, 1, 1], [], []>} : vector<128x32xbf16>, vector<32x64xbf16>, vector<128x64xf32> -> vector<128x64xf32>
    %c0_15 = arith.constant 0 : index
    %c0_16 = arith.constant 0 : index
    %41 = vector.load %arg12[%c0_15, %c0_16] : memref<1x64xf32, #tpu.memory_space<vmem>>, vector<1x64xf32>
    %42 = vector.broadcast %41 : vector<1x64xf32> to vector<128x64xf32>
    %43 = arith.addf %40, %42 : vector<128x64xf32>
    %cst_17 = arith.constant 2.000000e-01 : f32
    %44 = vector.broadcast %cst_17 : f32 to vector<128x64xf32>
    %45 = arith.mulf %44, %43 : vector<128x64xf32>
    %46 = arith.maximumf %43, %45 : vector<128x64xf32>
    %47 = arith.truncf %46 : vector<128x64xf32> to vector<128x64xbf16>
    %c0_18 = arith.constant 0 : index
    %c0_19 = arith.constant 0 : index
    %48 = vector.load %arg7[%c0_18, %c0_19] : memref<64x128xbf16, #tpu.memory_space<vmem>>, vector<64x128xbf16>
    %cst_20 = arith.constant dense<0.000000e+00> : vector<128x128xf32>
    %49 = tpu.matmul %47, %48, %cst_20 {dimension_numbers = #tpu.dot_dimension_numbers<[1], [0], [0], [1], [0, 0, 1, 1], [], []>} : vector<128x64xbf16>, vector<64x128xbf16>, vector<128x128xf32> -> vector<128x128xf32>
    %c0_21 = arith.constant 0 : index
    %c0_22 = arith.constant 0 : index
    %50 = vector.load %arg13[%c0_21, %c0_22] : memref<1x128xf32, #tpu.memory_space<vmem>>, vector<1x128xf32>
    %51 = vector.broadcast %50 : vector<1x128xf32> to vector<128x128xf32>
    %52 = arith.addf %49, %51 : vector<128x128xf32>
    %cst_23 = arith.constant 2.000000e-01 : f32
    %53 = vector.broadcast %cst_23 : f32 to vector<128x128xf32>
    %54 = arith.mulf %53, %52 : vector<128x128xf32>
    %55 = arith.maximumf %52, %54 : vector<128x128xf32>
    %56 = arith.truncf %55 : vector<128x128xf32> to vector<128x128xbf16>
    %c0_24 = arith.constant 0 : index
    %c0_25 = arith.constant 0 : index
    %57 = vector.load %arg8[%c0_24, %c0_25] : memref<128x256xbf16, #tpu.memory_space<vmem>>, vector<128x256xbf16>
    %cst_26 = arith.constant dense<0.000000e+00> : vector<128x256xf32>
    %58 = tpu.matmul %56, %57, %cst_26 {dimension_numbers = #tpu.dot_dimension_numbers<[1], [0], [0], [1], [0, 0, 1, 1], [], []>} : vector<128x128xbf16>, vector<128x256xbf16>, vector<128x256xf32> -> vector<128x256xf32>
    %c0_27 = arith.constant 0 : index
    %c0_28 = arith.constant 0 : index
    %59 = vector.load %arg14[%c0_27, %c0_28] : memref<1x256xf32, #tpu.memory_space<vmem>>, vector<1x256xf32>
    %60 = vector.broadcast %59 : vector<1x256xf32> to vector<128x256xf32>
    %61 = arith.addf %58, %60 : vector<128x256xf32>
    %cst_29 = arith.constant 2.000000e-01 : f32
    %62 = vector.broadcast %cst_29 : f32 to vector<128x256xf32>
    %63 = arith.mulf %62, %61 : vector<128x256xf32>
    %64 = arith.maximumf %61, %63 : vector<128x256xf32>
    %65 = arith.truncf %64 : vector<128x256xf32> to vector<128x256xbf16>
    %c0_30 = arith.constant 0 : index
    %c0_31 = arith.constant 0 : index
    %66 = vector.load %arg9[%c0_30, %c0_31] : memref<256x512xbf16, #tpu.memory_space<vmem>>, vector<256x512xbf16>
    %cst_32 = arith.constant dense<0.000000e+00> : vector<128x512xf32>
    %67 = tpu.matmul %65, %66, %cst_32 {dimension_numbers = #tpu.dot_dimension_numbers<[1], [0], [0], [1], [0, 0, 1, 1], [], []>} : vector<128x256xbf16>, vector<256x512xbf16>, vector<128x512xf32> -> vector<128x512xf32>
    %c0_33 = arith.constant 0 : index
    %c0_34 = arith.constant 0 : index
    %68 = vector.load %arg15[%c0_33, %c0_34] : memref<1x512xf32, #tpu.memory_space<vmem>>, vector<1x512xf32>
    %69 = vector.broadcast %68 : vector<1x512xf32> to vector<128x512xf32>
    %70 = arith.addf %67, %69 : vector<128x512xf32>
    %cst_35 = arith.constant 2.000000e-01 : f32
    %71 = vector.broadcast %cst_35 : f32 to vector<128x512xf32>
    %72 = arith.mulf %71, %70 : vector<128x512xf32>
    %73 = arith.maximumf %70, %72 : vector<128x512xf32>
    %cst_36 = arith.constant dense<0xFF800000> : vector<512xf32>
    %74 = vector.multi_reduction <maximumf>, %73, %cst_36 [0] : vector<128x512xf32> to vector<512xf32>
    %75 = vector.shape_cast %74 : vector<512xf32> to vector<1x512xf32>
    %c0_i32 = arith.constant 0 : i32
    %76 = arith.cmpi eq, %arg2, %c0_i32 : i32
    %77 = arith.extui %76 : i1 to i32
    %c0_i32_37 = arith.constant 0 : i32
    %78 = arith.cmpi ne, %77, %c0_i32_37 : i32
    scf.if %78 {
      %cst_46 = arith.constant 0xFF800000 : f32
      %85 = vector.broadcast %cst_46 : f32 to vector<1x512xf32>
      %c0_47 = arith.constant 0 : index
      %c0_48 = arith.constant 0 : index
      %c0_49 = arith.constant 0 : index
      %c0_50 = arith.constant 0 : index
      %86 = vector.load %arg16[%c0_47, %c0_48, %c0_49, %c0_50] : memref<1x1x1x512xf32, #tpu.memory_space<vmem>>, vector<1x1x1x512xf32>
      %87 = vector.shape_cast %86 : vector<1x1x1x512xf32> to vector<1x512xf32>
      %88 = vector.shape_cast %85 : vector<1x512xf32> to vector<1x1x1x512xf32>
      tpu.vector_store %arg16[%c0_47, %c0_48, %c0_49, %c0_50], %88 {strides = array<i32>} : memref<1x1x1x512xf32, #tpu.memory_space<vmem>>, vector<1x1x1x512xf32>,
    } else {
    }
    %c0_38 = arith.constant 0 : index
    %c0_39 = arith.constant 0 : index
    %c0_40 = arith.constant 0 : index
    %c0_41 = arith.constant 0 : index
    %79 = vector.load %arg16[%c0_38, %c0_39, %c0_40, %c0_41] : memref<1x1x1x512xf32, #tpu.memory_space<vmem>>, vector<1x1x1x512xf32>
    %80 = vector.shape_cast %79 : vector<1x1x1x512xf32> to vector<1x512xf32>
    %81 = arith.maximumf %80, %75 : vector<1x512xf32>
    %c0_42 = arith.constant 0 : index
    %c0_43 = arith.constant 0 : index
    %c0_44 = arith.constant 0 : index
    %c0_45 = arith.constant 0 : index
    %82 = vector.load %arg16[%c0_42, %c0_43, %c0_44, %c0_45] : memref<1x1x1x512xf32, #tpu.memory_space<vmem>>, vector<1x1x1x512xf32>
    %83 = vector.shape_cast %82 : vector<1x1x1x512xf32> to vector<1x512xf32>
    %84 = vector.shape_cast %81 : vector<1x512xf32> to vector<1x1x1x512xf32>
    tpu.vector_store %arg16[%c0_42, %c0_43, %c0_44, %c0_45], %84 {strides = array<i32>} : memref<1x1x1x512xf32, #tpu.memory_space<vmem>>, vector<1x1x1x512xf32>,
    return
  }
  func.func @transform_0(%arg0: i32, %arg1: i32, %arg2: i32) -> (i32, i32, i32) {
    %c4_i32 = arith.constant 4 : i32
    %0 = arith.muli %arg1, %c4_i32 : i32
    %1 = arith.addi %0, %arg2 : i32
    %c0_i32 = arith.constant 0 : i32
    %c0_i32_0 = arith.constant 0 : i32
    return %arg0, %1, %c0_i32 : i32, i32, i32
  }
  func.func @transform_1(%arg0: i32, %arg1: i32, %arg2: i32) -> (i32, i32) {
    %c0_i32 = arith.constant 0 : i32
    %c0_i32_0 = arith.constant 0 : i32
    %c0_i32_1 = arith.constant 0 : i32
    return %c0_i32, %c0_i32_0 : i32, i32
  }
  func.func @transform_2(%arg0: i32, %arg1: i32, %arg2: i32) -> (i32, i32) {
    %c0_i32 = arith.constant 0 : i32
    %c0_i32_0 = arith.constant 0 : i32
    %c0_i32_1 = arith.constant 0 : i32
    return %c0_i32, %c0_i32_0 : i32, i32
  }
  func.func @transform_3(%arg0: i32, %arg1: i32, %arg2: i32) -> (i32, i32) {
    %c0_i32 = arith.constant 0 : i32
    %c0_i32_0 = arith.constant 0 : i32
    %c0_i32_1 = arith.constant 0 : i32
    return %c0_i32, %c0_i32_0 : i32, i32
  }
  func.func @transform_4(%arg0: i32, %arg1: i32, %arg2: i32) -> (i32, i32) {
    %c0_i32 = arith.constant 0 : i32
    %c0_i32_0 = arith.constant 0 : i32
    %c0_i32_1 = arith.constant 0 : i32
    return %c0_i32, %c0_i32_0 : i32, i32
  }
  func.func @transform_5(%arg0: i32, %arg1: i32, %arg2: i32) -> (i32, i32) {
    %c0_i32 = arith.constant 0 : i32
    %c0_i32_0 = arith.constant 0 : i32
    %c0_i32_1 = arith.constant 0 : i32
    return %c0_i32, %c0_i32_0 : i32, i32
  }
  func.func @transform_6(%arg0: i32, %arg1: i32, %arg2: i32) -> (i32, i32) {
    %c0_i32 = arith.constant 0 : i32
    %c0_i32_0 = arith.constant 0 : i32
    %c0_i32_1 = arith.constant 0 : i32
    return %c0_i32, %c0_i32_0 : i32, i32
  }
  func.func @transform_7(%arg0: i32, %arg1: i32, %arg2: i32) -> (i32, i32) {
    %c0_i32 = arith.constant 0 : i32
    %c0_i32_0 = arith.constant 0 : i32
    %c0_i32_1 = arith.constant 0 : i32
    return %c0_i32, %c0_i32_0 : i32, i32
  }
  func.func @transform_8(%arg0: i32, %arg1: i32, %arg2: i32) -> (i32, i32) {
    %c0_i32 = arith.constant 0 : i32
    %c0_i32_0 = arith.constant 0 : i32
    %c0_i32_1 = arith.constant 0 : i32
    return %c0_i32, %c0_i32_0 : i32, i32
  }
  func.func @transform_9(%arg0: i32, %arg1: i32, %arg2: i32) -> (i32, i32) {
    %c0_i32 = arith.constant 0 : i32
    %c0_i32_0 = arith.constant 0 : i32
    %c0_i32_1 = arith.constant 0 : i32
    return %c0_i32, %c0_i32_0 : i32, i32
  }
  func.func @transform_10(%arg0: i32, %arg1: i32, %arg2: i32) -> (i32, i32) {
    %c0_i32 = arith.constant 0 : i32
    %c0_i32_0 = arith.constant 0 : i32
    %c0_i32_1 = arith.constant 0 : i32
    return %c0_i32, %c0_i32_0 : i32, i32
  }
  func.func @transform_11(%arg0: i32, %arg1: i32, %arg2: i32) -> (i32, i32) {
    %c0_i32 = arith.constant 0 : i32
    %c0_i32_0 = arith.constant 0 : i32
    %c0_i32_1 = arith.constant 0 : i32
    return %c0_i32, %c0_i32_0 : i32, i32
  }
  func.func @transform_12(%arg0: i32, %arg1: i32, %arg2: i32) -> (i32, i32) {
    %c0_i32 = arith.constant 0 : i32
    %c0_i32_0 = arith.constant 0 : i32
    %c0_i32_1 = arith.constant 0 : i32
    return %c0_i32, %c0_i32_0 : i32, i32
  }
  func.func @transform_13(%arg0: i32, %arg1: i32, %arg2: i32) -> (i32, i32, i32, i32) {
    %c0_i32 = arith.constant 0 : i32
    %c0_i32_0 = arith.constant 0 : i32
    %c0_i32_1 = arith.constant 0 : i32
    return %arg0, %arg1, %c0_i32, %c0_i32_0 : i32, i32, i32, i32
  }
}

</mosaic_0001>

<bundles_post_ra>
// kernel: discriminator_forward.1
= control target key start
LH: loop header
LB: loop body
LE: loop exit
PB: predicated region body
PF: predicated region fallthrough
CT: control target
= control target key end

     0   :  { %s3480_s25 = smov 0   ;;  %s3482_s26 = smov 0   ;;  %s4479_s0 = inlined_call_operand.vmem [shape: f32[2,512,3], index: 0, kind: input, shape index: {}]   ;;  %s4480_s1 = inlined_call_operand.vmem [shape: bf16[3,16], index: 1, kind: input, shape index: {}]   ;;  %s4481_s2 = inlined_call_operand.vmem [shape: bf16[16,32], index: 2, kind: input, shape index: {}]   ;;  %s4482_s3 = inlined_call_operand.vmem [shape: bf16[32,64], index: 3, kind: input, shape index: {}]   ;;  %s4483_s4 = inlined_call_operand.vmem [shape: bf16[64,128], index: 4, kind: input, shape index: {}]   ;;  %s4484_s5 = inlined_call_operand.vmem [shape: bf16[128,256], index: 5, kind: input, shape index: {}]   ;;  %s4485_s6 = inlined_call_operand.vmem [shape: bf16[256,512], index: 6, kind: input, shape index: {}]   ;;  %s4486_s7 = inlined_call_operand.vmem [shape: f32[1,16], index: 7, kind: input, shape index: {}]   ;;  %s4487_s8 = inlined_call_operand.vmem [shape: f32[1,32], index: 8, kind: input, shape index: {}]   ;;  %s4488_s9 = inlined_call_operand.vmem [shape: f32[1,64], index: 9, kind: input, shape index: {}]   ;;  %s4489_s10 = inlined_call_operand.vmem [shape: f32[1,128], index: 10, kind: input, shape index: {}]   ;;  %s4490_s11 = inlined_call_operand.vmem [shape: f32[1,256], index: 11, kind: input, shape index: {}]   ;;  %s4491_s12 = inlined_call_operand.vmem [shape: f32[1,512], index: 12, kind: input, shape index: {}]   ;;  %s4492_s13 = inlined_call_operand.vmem [shape: f32[2,1,1,512], index: 13, kind: output, shape index: {}]  }
   0x1   :  { %s3484_s27 = smov 0   ;;  %s3486_s28 = smov 0  }
   0x2   :  { %s3488_s29 = smov 0  }
   0x3 LB: > { %s35_s30 = sadd.s32 1, %s3396_s27  ;;  %s42_s14 = sadd.s32 1, %s3400_s28  ;;  %s3404_s29 = sphi %s3488_s29, %s23_s29   ;;  %s3400_s28 = sphi %s3486_s28, %s4498_s28   ;;  %s3396_s27 = sphi %s3484_s27, %s4497_s27   ;;  %s3392_s26 = sphi %s3482_s26, %s4496_s26   ;;  %s3388_s25 = sphi %s3480_s25, %s4495_s25  }
   0x4   : > { %p36_p0 = scmp.ge.s32.totalorder %s35_s30, 4  ;;  %p2711_p1 = scmp.ge.s32.totalorder %s3404_s29, 1 }
   0x5   : > { %p423_p2 = scmp.lt.s32.totalorder %s3404_s29, 9 }
   0x6   : > { %s4500_s30 = smov (%p36_p0, %s35_s30), 0  ;;  %s4502_s14 = smov (!%p36_p0, %s42_s14), %s3400_s28 }
   0x7   : > { %p424_p3 = pnand %p2711_p1, %p423_p2  ;;  %p44_p4 = scmp.ge.s32.totalorder %s4502_s14, 2 }
   0x8   : > { %s2712_s15 = sshll.u32 (!%p424_p3), %s3388_s25, 4  ;;  %p479_p5 = scmp.lt.s32.totalorder (!%p424_p3), %s3392_s26, 1 }
   0x9   : > { %s4504_s14 = smov (%p44_p4, %s4502_s14), 0  ;;  %427 = sbr.rel (%p424_p3) target bundleno = 1155 (0x483), region = 72 }
   0xa   : > { %4493 = sst [smem:[#allocation2_spill]] %s4504_s14  ;;  %p481_p6 = scmp.lt.s32.totalorder (!%p424_p3), %s2712_s15, 63 }
   0xb   : > { %p3088_p7 = scmp.ne.s32.totalorder (!%p424_p3), %s3388_s25, 0 }
   0xe   : > { %v3406_v0 = vmov 2   ;;  %v3407_v1 = vmov 0   ;;  %s4506_s26 = smov (!%p479_p5, %s3392_s26), 1  ;;  %v3408_v2 = vmov 1   ;;  %s4508_s15 = smov (!%p481_p6, %s2712_s15), 63  ;;  %v3091_v27 = vld [vmem:[%s4481_s2] sm:$0xff] }
   0xf   : > { %3237 = vset.pattern.permute.xlu1 %v3406_v0  ;;  %3225 = vset.pattern.permute.xlu0 %v3407_v1  ;;  %s2713_s16 = sshll.u32 %s4506_s26, 6  ;;  %s2715_s17 = sshll.u32 %s4506_s26, 2  ;;  %v547_v29 = vld [vmem:[%s4480_s1] sm:$0x3]  ;;  %vm912_vm0 = vcmask 130048   ;;  %vm1046_vm1 = vcmask 261120  }
  0x10   : > { %3249 = vset.pattern.permute.xlu2 %v3408_v2  ;;  %s484_s18 = sadd.s32 %s2713_s16, %s4508_s15  ;;  %s3519_s21 = scalar_lea.vmem %s4492_s13, %s2715_s17  ;;  %944 = vmatpush.bf16.msra.mxu0 %v3091_v27  ;;  %v548_v31 = vunpack.c.l.bf16 %v547_v29  ;;  %v3571_v40 = vld [vmem:[%s4486_s7] ss:$0 sm:$0xff]  ;;  %vm1196_vm2 = vcmask 523264  }
  0x11   : > { %s2714_s22 = sshll.u32 %s484_s18, 3  ;;  %3178 = vmatpush.bf16.msra.mxu1 %v3091_v27  ;;  %3179 = vmatpush.bf16.msra.mxu2 %v3091_v27 }
  0x12   : > { %s3524_s14 = scalar_lea.vmem %s4479_s0, %s2714_s22  ;;  %3180 = vmatpush.bf16.msra.mxu3 %v3091_v27  ;;  %v3564_v34 = vperm.slane %v548_v31, 0  ;;  %v3566_v37 = vperm.slane %v548_v31, 2  ;;  %v3575_v43 = vperm.slane %v548_v31, 1 }
  0x13   : > { %v499_v3 = vld [vmem:[%s3524_s14] sm:$0xff]  ;;  %v500_v4 = vld [vmem:[%s3524_s14 + $0x8] sm:$0xff]  ;;  %v501_v5 = vld [vmem:[%s3524_s14 + $0x10] sm:$0xff] }
  0x14   : > { %v502_v6 = vld [vmem:[%s3524_s14 + $0x18] sm:$0xff]  ;;  %v3238_v7 = vpack.i.bf16 %v500_v4, %v499_v3  ;;  %v503_v9 = vld [vmem:[%s3524_s14 + $0x20] sm:$0xff]  ;;  %v504_v10 = vld [vmem:[%s3524_s14 + $0x28] sm:$0xff] }
  0x15   : > { %v3250_v8 = vpack.i.bf16 %v502_v6, %v501_v5  ;;  %v505_v11 = vld [vmem:[%s3524_s14 + $0x30] sm:$0xff]  ;;  %v506_v12 = vld [vmem:[%s3524_s14 + $0x38] sm:$0xff]  ;;  %v3261_v13 = vpack.i.bf16 %v504_v10, %v503_v9  ;;  %v507_v14 = vld [vmem:[%s3524_s14 + $0x40] sm:$0xff] }
  0x16   : > { %3239 = vperm.xlu1 %3237, %v3238_v7   ;;  %3227 = vperm.xlu0 %3225, %v3238_v7   ;;  %v508_v15 = vld [vmem:[%s3524_s14 + $0x48] sm:$0xff]  ;;  %v3278_v16 = vpack.i.bf16 %v506_v12, %v505_v11  ;;  %v511_v17 = vld [vmem:[%s3524_s14 + $0x60] sm:$0xff]  ;;  %v509_v20 = vld [vmem:[%s3524_s14 + $0x50] sm:$0xff] }
  0x17   : > { %3251 = vperm.xlu2 %3249, %v3250_v8   ;;  %v512_v18 = vld [vmem:[%s3524_s14 + $0x68] sm:$0xff]  ;;  %v3301_v19 = vpack.i.bf16 %v508_v15, %v507_v14  ;;  %v510_v21 = vld [vmem:[%s3524_s14 + $0x58] sm:$0xff]  ;;  %v513_v23 = vld [vmem:[%s3524_s14 + $0x70] sm:$0xff] }
  0x18   : > { %v3329_v22 = vpack.i.bf16 %v512_v18, %v511_v17  ;;  %v514_v24 = vld [vmem:[%s3524_s14 + $0x78] sm:$0xff]  ;;  %v3311_v25 = vpack.i.bf16 %v510_v21, %v509_v20 }
  0x19   : > { %v3357_v26 = vpack.i.bf16 %v514_v24, %v513_v23 }
  0x1e   : > { %3243 = vset.pattern.permute.xlu1 %v3407_v1  ;;  %3231 = vset.pattern.permute.xlu0 %v3408_v2 }
  0x1f   : > { %3245 = vperm.xlu1 %3243, %v3250_v8   ;;  %3233 = vperm.xlu0 %3231, %v3238_v7  }
  0x20   : > { %3255 = vset.pattern.permute.xlu2 %v3406_v0 }
  0x21   : > { %3257 = vperm.xlu2 %3255, %v3250_v8  }
  0x27   : > { %3262 = vperm.xlu1 %3243, %v3261_v13   ;;  %3272 = vset.pattern.permute.xlu0 %v3406_v0 }
  0x28   : > { %3274 = vperm.xlu0 %3272, %v3261_v13  }
  0x29   : > { %3266 = vset.pattern.permute.xlu2 %v3408_v2 }
  0x2a   : > { %3268 = vperm.xlu2 %3266, %v3261_v13  }
  0x2f   : > { %3279 = vperm.xlu1 %3243, %v3278_v16  }
  0x30   : > { %3300 = vset.pattern.permute.xlu0 %v3408_v2 }
  0x31   : > { %3302 = vperm.xlu0 %3300, %v3301_v19  }
  0x32   : > { %3284 = vperm.xlu2 %3266, %v3278_v16  }
  0x37   : > { %3288 = vset.pattern.permute.xlu1 %v3406_v0 }
  0x38   : > { %3290 = vperm.xlu1 %3288, %v3278_v16  }
  0x39   : > { %3328 = vset.pattern.permute.xlu0 %v3407_v1 }
  0x3a   : > { %3294 = vset.pattern.permute.xlu2 %v3407_v1  ;;  %3330 = vperm.xlu0 %3328, %v3329_v22  }
  0x3b   : > { %3296 = vperm.xlu2 %3294, %v3301_v19  }
  0x40   : > { %3307 = vperm.xlu1 %3288, %v3301_v19  }
  0x42   : > { %3356 = vset.pattern.permute.xlu0 %v3406_v0 }
  0x43   : > { %3312 = vperm.xlu2 %3294, %v3311_v25   ;;  %3358 = vperm.xlu0 %3356, %v3357_v26  }
  0x48   : > { %3316 = vset.pattern.permute.xlu1 %v3408_v2 }
  0x49   : > { %3318 = vperm.xlu1 %3316, %v3311_v25  }
  0x4b   : > { %3322 = vset.pattern.permute.xlu2 %v3406_v0 }
  0x4c   : > { %3324 = vperm.xlu2 %3322, %v3311_v25  }
  0x51   : > { %3335 = vperm.xlu1 %3316, %v3329_v22  }
  0x54   : > { %3340 = vperm.xlu2 %3322, %v3329_v22  }
  0x59   : > { %3344 = vset.pattern.permute.xlu1 %v3407_v1 }
  0x5a   : > { %3346 = vperm.xlu1 %3344, %v3357_v26  }
  0x5c   : > { %3350 = vset.pattern.permute.xlu2 %v3408_v2 }
  0x5d   : > { %3352 = vperm.xlu2 %3350, %v3357_v26  }
  0x71   : > { %v3252_v28 = vpop.permute.xlu2 %3251 }
  0x72   : > { %v3254_v57 = vunpack.i.h.bf16 %v3252_v28  ;;  %v3253_v58 = vunpack.i.l.bf16 %v3252_v28 }
  0x74   : > { %v734_v3 = vmul.f32 %v3254_v57, %v3575_v43  ;;  %v733_v4 = vmul.f32 %v3253_v58, %v3575_v43 }
  0x7b   : > { %v3562_v30 = vpop.permute.xlu2 %3257 }
  0x7c   : > { %v3260_v5 = vunpack.i.h.bf16 %v3562_v30  ;;  %v3259_v6 = vunpack.i.l.bf16 %v3562_v30 }
  0x7e   : > { %v831_v22 = vmul.f32 %v3260_v5, %v3566_v37  ;;  %v830_v31 = vmul.f32 %v3259_v6, %v3566_v37 }
  0x84   : > { %v3269_v44 = vpop.permute.xlu2 %3268 }
  0x85   : > { %v3271_v1 = vunpack.i.h.bf16 %v3269_v44  ;;  %v3270_v2 = vunpack.i.l.bf16 %v3269_v44 }
  0x87   : > { %v736_v20 = vmul.f32 %v3271_v1, %v3575_v43  ;;  %v735_v21 = vmul.f32 %v3270_v2, %v3575_v43 }
  0x88   : > { %v3228_v32 = vpop.permute.xlu0 %3227  ;;  %v3240_v33 = vpop.permute.xlu1 %3239 }
  0x89   : > { %v3230_v35 = vunpack.i.h.bf16 %v3228_v32  ;;  %v3229_v36 = vunpack.i.l.bf16 %v3228_v32  ;;  %v3242_v38 = vunpack.i.h.bf16 %v3240_v33  ;;  %v3241_v39 = vunpack.i.l.bf16 %v3240_v33 }
  0x8b   : > { %v632_v41 = vmul.f32 %v3230_v35, %v3564_v34  ;;  %v631_v42 = vmul.f32 %v3229_v36, %v3564_v34  ;;  %v829_v51 = vmul.f32 %v3242_v38, %v3566_v37  ;;  %v828_v52 = vmul.f32 %v3241_v39, %v3566_v37 }
  0x8c   : > { %v3285_v13 = vpop.permute.xlu2 %3284 }
  0x8d   : > { %v651_v53 = vadd.f32 %v3571_v40, %v632_v41  ;;  %v650_v54 = vadd.f32 %v3571_v40, %v631_v42 }
  0x91   : > { %v3246_v45 = vpop.permute.xlu1 %3245  ;;  %v3234_v46 = vpop.permute.xlu0 %3233 }
  0x92   : > { %v3248_v47 = vunpack.i.h.bf16 %v3246_v45  ;;  %v3247_v48 = vunpack.i.l.bf16 %v3246_v45  ;;  %v3236_v49 = vunpack.i.h.bf16 %v3234_v46  ;;  %v3235_v50 = vunpack.i.l.bf16 %v3234_v46 }
  0x94   : > { %v732_v55 = vmul.f32 %v3236_v49, %v3575_v43  ;;  %v731_v56 = vmul.f32 %v3235_v50, %v3575_v43  ;;  %v634_v59 = vmul.f32 %v3248_v47, %v3564_v34  ;;  %v633_v60 = vmul.f32 %v3247_v48, %v3564_v34 }
  0x95   : > { %v3297_v44 = vpop.permute.xlu2 %3296 }
  0x96   : > { %v747_v61 = vadd.f32 %v731_v56, %v650_v54  ;;  %v748_v62 = vadd.f32 %v732_v55, %v651_v53  ;;  %v653_v8 = vadd.f32 %v3571_v40, %v634_v59  ;;  %v652_v9 = vadd.f32 %v3571_v40, %v633_v60 }
  0x97   : > { %v3299_v58 = vunpack.i.h.bf16 %v3297_v44  ;;  %v3298_v59 = vunpack.i.l.bf16 %v3297_v44 }
  0x98   : > { %v844_v63 = vadd.f32 %v828_v52, %v747_v61  ;;  %v845_v0 = vadd.f32 %v829_v51, %v748_v62  ;;  %v749_v29 = vadd.f32 %v733_v4, %v652_v9  ;;  %v750_v30 = vadd.f32 %v734_v3, %v653_v8 }
  0x99   : > { %v3263_v7 = vpop.permute.xlu1 %3262  ;;  %v3287_v51 = vunpack.i.h.bf16 %v3285_v13  ;;  %v3286_v52 = vunpack.i.l.bf16 %v3285_v13  ;;  %v640_v6 = vmul.f32 %v3299_v58, %v3564_v34 }
  0x9a   : > { %v3265_v10 = vunpack.i.h.bf16 %v3263_v7  ;;  %v3264_v11 = vunpack.i.l.bf16 %v3263_v7  ;;  %v3275_v12 = vpop.permute.xlu0 %3274  ;;  %v860_v16 = vmul.f32 0.2, %v844_v63  ;;  %v861_v17 = vmul.f32 0.2, %v845_v0 }
  0x9b   : > { %v3277_v14 = vunpack.i.h.bf16 %v3275_v12  ;;  %v3276_v15 = vunpack.i.l.bf16 %v3275_v12  ;;  %v846_v45 = vadd.f32 %v830_v31, %v749_v29  ;;  %v847_v46 = vadd.f32 %v831_v22, %v750_v30 }
  0x9c   : > { %v636_v18 = vmul.f32 %v3265_v10, %v3564_v34  ;;  %v635_v19 = vmul.f32 %v3264_v11, %v3564_v34  ;;  %v876_v23 = vmax.f32 %v844_v63, %v860_v16  ;;  %v877_v24 = vmax.f32 %v845_v0, %v861_v17 }
  0x9d   : > { %v833_v27 = vmul.f32 %v3277_v14, %v3566_v37  ;;  %v832_v28 = vmul.f32 %v3276_v15, %v3566_v37  ;;  %v862_v55 = vmul.f32 0.2, %v846_v45  ;;  %v863_v56 = vmul.f32 0.2, %v847_v46  ;;  %v3313_v8 = vpop.permute.xlu2 %3312 }
  0x9e   : > { %v655_v25 = vadd.f32 %v3571_v40, %v636_v18  ;;  %v654_v26 = vadd.f32 %v3571_v40, %v635_v19  ;;  %v892_v32 = vpack.c.bf16 %v877_v24, %v876_v23  ;;  %v738_v62 = vmul.f32 %v3287_v51, %v3575_v43 }
  0x9f   : > { %v737_v63 = vmul.f32 %v3286_v52, %v3575_v43  ;;  %v878_v4 = vmax.f32 %v846_v45, %v862_v55  ;;  %v879_v5 = vmax.f32 %v847_v46, %v863_v56  ;;  %v639_v7 = vmul.f32 %v3298_v59, %v3564_v34 }
  0xa0   : > { %v751_v33 = vadd.f32 %v735_v21, %v654_v26  ;;  %v752_v35 = vadd.f32 %v736_v20, %v655_v25  ;;  %2720 = vmatmul.msk.bf16.vlgmr.msra.gmra.mxu0 %vm912_vm0, %v892_v32  ;;  %v659_v18 = vadd.f32 %v3571_v40, %v640_v6 }
  0xa1   : > { %v3280_v36 = vpop.permute.xlu1 %3279  ;;  %v893_v17 = vpack.c.bf16 %v879_v5, %v878_v4  ;;  %v658_v19 = vadd.f32 %v3571_v40, %v639_v7 }
  0xa2   : > { %v849_v38 = vadd.f32 %v833_v27, %v752_v35  ;;  %v848_v39 = vadd.f32 %v832_v28, %v751_v33  ;;  %v3282_v41 = vunpack.i.h.bf16 %v3280_v36  ;;  %v3281_v42 = vunpack.i.l.bf16 %v3280_v36 }
  0xa3   : > { %v3303_v0 = vpop.permute.xlu0 %3302  ;;  %v3315_v27 = vunpack.i.h.bf16 %v3313_v8  ;;  %v3314_v28 = vunpack.i.l.bf16 %v3313_v8 }
  0xa4   : > { %v865_v47 = vmul.f32 0.2, %v849_v38  ;;  %v864_v48 = vmul.f32 0.2, %v848_v39  ;;  %v638_v49 = vmul.f32 %v3282_v41, %v3564_v34  ;;  %v637_v50 = vmul.f32 %v3281_v42, %v3564_v34 }
  0xa5   : > { %v3305_v9 = vunpack.i.h.bf16 %v3303_v0  ;;  %v3304_v10 = vunpack.i.l.bf16 %v3303_v0 }
  0xa6   : > { %v880_v53 = vmax.f32 %v848_v39, %v864_v48  ;;  %v881_v54 = vmax.f32 %v849_v38, %v865_v47  ;;  %v657_v60 = vadd.f32 %v3571_v40, %v638_v49  ;;  %v656_v61 = vadd.f32 %v3571_v40, %v637_v50  ;;  %v3325_v36 = vpop.permute.xlu2 %3324 }
  0xa7   : > { %v740_v22 = vmul.f32 %v3305_v9, %v3575_v43  ;;  %v739_v23 = vmul.f32 %v3304_v10, %v3575_v43  ;;  %v642_v38 = vmul.f32 %v3315_v27, %v3564_v34  ;;  %v641_v39 = vmul.f32 %v3314_v28, %v3564_v34 }
  0xa8   : > { %v894_v57 = vpack.c.bf16 %v881_v54, %v880_v53  ;;  %v753_v11 = vadd.f32 %v737_v63, %v656_v61  ;;  %v754_v12 = vadd.f32 %v738_v62, %v657_v60  ;;  %v3327_v46 = vunpack.i.h.bf16 %v3325_v36  ;;  %v3093_v62 = vld [vmem:[%s4482_s3 + $0x8] sm:$0xff] }
  0xa9   : > { %v756_v33 = vadd.f32 %v740_v22, %v659_v18  ;;  %v755_v35 = vadd.f32 %v739_v23, %v658_v19  ;;  %v3326_v47 = vunpack.i.l.bf16 %v3325_v36  ;;  %v661_v51 = vadd.f32 %v3571_v40, %v642_v38  ;;  %1077 = vmatpush.bf16.msrb.mxu1 %v3093_v62  ;;  %v3658_v62 = vld [vmem:[%s4487_s8] ss:$0 sm:$0xff] }
  0xaa   : > { %v3291_v1 = vpop.permute.xlu1 %3290  ;;  %2722 = vmatmul.msk.bf16.vlgmr.msra.gmra.mxu1 %vm912_vm0, %v894_v57  ;;  %v660_v52 = vadd.f32 %v3571_v40, %v641_v39  ;;  %v839_v59 = vmul.f32 %v3327_v46, %v3566_v37 }
  0xab   : > { %v3293_v2 = vunpack.i.h.bf16 %v3291_v1  ;;  %v3292_v3 = vunpack.i.l.bf16 %v3291_v1  ;;  %v838_v60 = vmul.f32 %v3326_v47, %v3566_v37 }
  0xac   : > { %v3331_v42 = vpop.permute.xlu0 %3330 }
  0xad   : > { %v835_v13 = vmul.f32 %v3293_v2, %v3566_v37  ;;  %v834_v14 = vmul.f32 %v3292_v3, %v3566_v37  ;;  %v3333_v49 = vunpack.i.h.bf16 %v3331_v42  ;;  %v3332_v50 = vunpack.i.l.bf16 %v3331_v42  ;;  %v3092_v3 = vld [vmem:[%s4482_s3] sm:$0xff] }
  0xae   : > { %v3341_v61 = vpop.permute.xlu2 %3340  ;;  %1078 = vmatpush.bf16.msrb.mxu1 %v3092_v3 }
  0xaf   : > { %v850_v15 = vadd.f32 %v834_v14, %v753_v11  ;;  %v851_v16 = vadd.f32 %v835_v13, %v754_v12  ;;  %v644_v63 = vmul.f32 %v3333_v49, %v3564_v34  ;;  %v643_v0 = vmul.f32 %v3332_v50, %v3564_v34 }
  0xb0   : > { %2721 = vmatmul.msk.bf16.gmra.mxu0 %vm912_vm0, %v893_v17  ;;  %v3343_v6 = vunpack.i.h.bf16 %v3341_v61  ;;  %v3342_v7 = vunpack.i.l.bf16 %v3341_v61 }
  0xb1   : > { %v866_v20 = vmul.f32 0.2, %v850_v15  ;;  %v867_v21 = vmul.f32 0.2, %v851_v16  ;;  %v663_v10 = vadd.f32 %v3571_v40, %v644_v63  ;;  %v662_v11 = vadd.f32 %v3571_v40, %v643_v0 }
  0xb2   : > { %v3308_v24 = vpop.permute.xlu1 %3307  ;;  %v841_v18 = vmul.f32 %v3343_v6, %v3566_v37  ;;  %v840_v19 = vmul.f32 %v3342_v7, %v3566_v37 }
  0xb3   : > { %v3310_v25 = vunpack.i.h.bf16 %v3308_v24  ;;  %v3309_v26 = vunpack.i.l.bf16 %v3308_v24  ;;  %v882_v29 = vmax.f32 %v850_v15, %v866_v20  ;;  %v883_v30 = vmax.f32 %v851_v16, %v867_v21 }
  0xb5   : > { %v837_v31 = vmul.f32 %v3310_v25, %v3566_v37  ;;  %v836_v32 = vmul.f32 %v3309_v26, %v3566_v37  ;;  %v895_v41 = vpack.c.bf16 %v883_v30, %v882_v29  ;;  %v3359_v29 = vpop.permute.xlu0 %3358 }
  0xb7   : > { %v853_v44 = vadd.f32 %v837_v31, %v756_v33  ;;  %v852_v45 = vadd.f32 %v836_v32, %v755_v35  ;;  %v3361_v33 = vunpack.i.h.bf16 %v3359_v29  ;;  %v3360_v35 = vunpack.i.l.bf16 %v3359_v29  ;;  %v3353_v42 = vpop.permute.xlu2 %3352 }
  0xb9   : > { %v868_v55 = vmul.f32 0.2, %v852_v45  ;;  %v869_v56 = vmul.f32 0.2, %v853_v44  ;;  %v842_v49 = vmul.f32 %v3360_v35, %v3566_v37 }
  0xba   : > { %2723 = vmatmul.msk.bf16.gmra.mxu1 %vm912_vm0, %v895_v41 }
  0xbb   : > { %v3319_v48 = vpop.permute.xlu1 %3318  ;;  %v884_v4 = vmax.f32 %v852_v45, %v868_v55  ;;  %v885_v5 = vmax.f32 %v853_v44, %v869_v56  ;;  %v3355_v44 = vunpack.i.h.bf16 %v3353_v42  ;;  %v3354_v45 = vunpack.i.l.bf16 %v3353_v42 }
  0xbc   : > { %v3321_v53 = vunpack.i.h.bf16 %v3319_v48  ;;  %v3320_v54 = vunpack.i.l.bf16 %v3319_v48  ;;  %v843_v48 = vmul.f32 %v3361_v33, %v3566_v37 }
  0xbd   : > { %v896_v17 = vpack.c.bf16 %v885_v5, %v884_v4 }
  0xbe   : > { %v742_v57 = vmul.f32 %v3321_v53, %v3575_v43  ;;  %v741_v58 = vmul.f32 %v3320_v54, %v3575_v43  ;;  %v745_v53 = vmul.f32 %v3354_v45, %v3575_v43 }
  0xc0   : > { %v758_v1 = vadd.f32 %v742_v57, %v661_v51  ;;  %v757_v2 = vadd.f32 %v741_v58, %v660_v52  ;;  %v746_v52 = vmul.f32 %v3355_v44, %v3575_v43 }
  0xc2   : > { %v854_v8 = vadd.f32 %v838_v60, %v757_v2  ;;  %v855_v9 = vadd.f32 %v839_v59, %v758_v1 }
  0xc3   : > { %v3336_v12 = vpop.permute.xlu1 %3335 }
  0xc4   : > { %v870_v13 = vmul.f32 0.2, %v854_v8  ;;  %v871_v14 = vmul.f32 0.2, %v855_v9  ;;  %v3338_v15 = vunpack.i.h.bf16 %v3336_v12  ;;  %v3337_v16 = vunpack.i.l.bf16 %v3336_v12 }
  0xc6   : > { %v886_v20 = vmax.f32 %v854_v8, %v870_v13  ;;  %v887_v21 = vmax.f32 %v855_v9, %v871_v14  ;;  %v744_v22 = vmul.f32 %v3338_v15, %v3575_v43  ;;  %v743_v23 = vmul.f32 %v3337_v16, %v3575_v43 }
  0xc8   : > { %v897_v24 = vpack.c.bf16 %v887_v21, %v886_v20  ;;  %v759_v25 = vadd.f32 %v743_v23, %v662_v11  ;;  %v760_v26 = vadd.f32 %v744_v22, %v663_v10 }
  0xca   : > { %2724 = vmatmul.msk.bf16.gmra.mxu1 %vm912_vm0, %v896_v17  ;;  %2725 = vmatmul.msk.bf16.vlgmr.msra.gmra.mxu2 %vm912_vm0, %v897_v24  ;;  %v856_v27 = vadd.f32 %v840_v19, %v759_v25  ;;  %v857_v28 = vadd.f32 %v841_v18, %v760_v26 }
  0xcc   : > { %v3347_v30 = vpop.permute.xlu1 %3346  ;;  %v872_v36 = vmul.f32 0.2, %v856_v27  ;;  %v873_v38 = vmul.f32 0.2, %v857_v28 }
  0xcd   : > { %v3349_v31 = vunpack.i.h.bf16 %v3347_v30  ;;  %v3348_v32 = vunpack.i.l.bf16 %v3347_v30 }
  0xce   : > { %v888_v50 = vmax.f32 %v856_v27, %v872_v36  ;;  %v889_v51 = vmax.f32 %v857_v28, %v873_v38 }
  0xcf   : > { %v646_v39 = vmul.f32 %v3349_v31, %v3564_v34  ;;  %v645_v41 = vmul.f32 %v3348_v32, %v3564_v34 }
  0xd0   : > { %v898_v34 = vpack.c.bf16 %v889_v51, %v888_v50 }
  0xd1   : > { %v665_v46 = vadd.f32 %v3571_v40, %v646_v39  ;;  %v664_v47 = vadd.f32 %v3571_v40, %v645_v41 }
  0xd3   : > { %v761_v54 = vadd.f32 %v745_v53, %v664_v47  ;;  %v762_v55 = vadd.f32 %v746_v52, %v665_v46 }
  0xd5   : > { %v859_v56 = vadd.f32 %v843_v48, %v762_v55  ;;  %v858_v57 = vadd.f32 %v842_v49, %v761_v54  ;;  %v3097_v48 = vld [vmem:[%s4483_s4 + $0x18] sm:$0xff] }
  0xd6   : > { %1225 = vmatpush.bf16.msrb.mxu2 %v3097_v48 }
  0xd7   : > { %v875_v58 = vmul.f32 0.2, %v859_v56  ;;  %v874_v59 = vmul.f32 0.2, %v858_v57 }
  0xd9   : > { %v890_v40 = vmax.f32 %v858_v57, %v874_v59  ;;  %v891_v60 = vmax.f32 %v859_v56, %v875_v58  ;;  %v3096_v57 = vld [vmem:[%s4483_s4 + $0x10] sm:$0xff] }
  0xda   : > { %2726 = vmatmul.msk.bf16.gmra.mxu2 %vm912_vm0, %v898_v34 }
  0xdb   : > { %v899_v61 = vpack.c.bf16 %v891_v60, %v890_v40  ;;  %1226 = vmatpush.bf16.msrb.mxu2 %v3096_v57 }
  0xdd   : > { %2727 = vmatmul.msk.bf16.vlgmr.msra.gmra.mxu3 %vm912_vm0, %v899_v61 }
 0x11d   : > { %v946_v37 = vpop.f32.mrf.mxu0 }
 0x11e   : > { %v947_v43 = vadd.f32 %v3658_v62, %v946_v37 }
 0x120   : > { %v986_v0 = vmul.f32 0.2, %v947_v43 }
 0x122   : > { %v1002_v3 = vmax.f32 %v947_v43, %v986_v0 }
 0x125   : > { %v948_v63 = vpop.f32.mrf.mxu0 }
 0x126   : > { %v949_v1 = vadd.f32 %v3658_v62, %v948_v63 }
 0x127   : > { %v956_v5 = vpop.f32.mrf.mxu1 }
 0x128   : > { %v987_v2 = vmul.f32 0.2, %v949_v1  ;;  %v957_v19 = vadd.f32 %v3658_v62, %v956_v5 }
 0x12a   : > { %v1003_v4 = vmax.f32 %v949_v1, %v987_v2  ;;  %v990_v21 = vmul.f32 0.2, %v957_v19 }
 0x12c   : > { %v1018_v6 = vpack.c.bf16 %v1003_v4, %v1002_v3  ;;  %v1006_v24 = vmax.f32 %v957_v19, %v990_v21  ;;  %v3095_v3 = vld [vmem:[%s4483_s4 + $0x8] sm:$0xff] }
 0x12d   : > { %v951_v7 = vpop.f32.mrf.mxu0  ;;  %1227 = vmatpush.bf16.msrb.mxu2 %v3095_v3  ;;  %v3113_v3 = vld [vmem:[%s4484_s5 + $0x74] sm:$0xf0] }
 0x12e   : > { %2736 = vmatmul.msk.bf16.vlgmr.msrb.gmra.mxu1 %vm1046_vm1, %v1018_v6  ;;  %v952_v8 = vadd.f32 %v3658_v62, %v951_v7  ;;  %v3094_v6 = vld [vmem:[%s4483_s4] sm:$0xff] }
 0x12f   : > { %v958_v9 = vpop.f32.mrf.mxu1 }
 0x130   : > { %v988_v11 = vmul.f32 0.2, %v952_v8  ;;  %v959_v18 = vadd.f32 %v3658_v62, %v958_v9 }
 0x131   : > { %1228 = vmatpush.bf16.msrb.mxu2 %v3094_v6  ;;  %v2828_v6 = vld [vmem:[%s4484_s5 + $0x78] sm:$0xf0] }
 0x132   : > { %v1004_v14 = vmax.f32 %v952_v8, %v988_v11  ;;  %v991_v20 = vmul.f32 0.2, %v959_v18 }
 0x134   : > { %v1007_v22 = vmax.f32 %v959_v18, %v991_v20 }
 0x135   : > { %v953_v10 = vpop.f32.mrf.mxu0 }
 0x136   : > { %v954_v12 = vadd.f32 %v3658_v62, %v953_v10  ;;  %v1020_v25 = vpack.c.bf16 %v1007_v22, %v1006_v24 }
 0x137   : > { %v961_v17 = vpop.f32.mrf.mxu1 }
 0x138   : > { %v989_v13 = vmul.f32 0.2, %v954_v12  ;;  %v962_v27 = vadd.f32 %v3658_v62, %v961_v17 }
 0x13a   : > { %v1005_v15 = vmax.f32 %v954_v12, %v989_v13  ;;  %v992_v30 = vmul.f32 0.2, %v962_v27 }
 0x13c   : > { %v1019_v16 = vpack.c.bf16 %v1005_v15, %v1004_v14  ;;  %v1008_v32 = vmax.f32 %v962_v27, %v992_v30 }
 0x13e   : > { %2737 = vmatmul.msk.bf16.gmra.mxu1 %vm1046_vm1, %v1019_v16 }
 0x13f   : > { %v963_v23 = vpop.f32.mrf.mxu1 }
 0x140   : > { %v964_v26 = vadd.f32 %v3658_v62, %v963_v23 }
 0x142   : > { %v993_v29 = vmul.f32 0.2, %v964_v26 }
 0x144   : > { %v1009_v31 = vmax.f32 %v964_v26, %v993_v29 }
 0x146   : > { %v1021_v33 = vpack.c.bf16 %v1009_v31, %v1008_v32 }
 0x147   : > { %v966_v28 = vpop.f32.mrf.mxu1 }
 0x148   : > { %v967_v39 = vadd.f32 %v3658_v62, %v966_v28 }
 0x14a   : > { %v994_v42 = vmul.f32 0.2, %v967_v39 }
 0x14c   : > { %v1010_v46 = vmax.f32 %v967_v39, %v994_v42 }
 0x14d   : > { %v971_v36 = vpop.f32.mrf.mxu2 }
 0x14e   : > { %2738 = vmatmul.msk.bf16.gmra.mxu1 %vm1046_vm1, %v1020_v25  ;;  %v972_v49 = vadd.f32 %v3658_v62, %v971_v36 }
 0x14f   : > { %v968_v35 = vpop.f32.mrf.mxu1 }
 0x150   : > { %v969_v38 = vadd.f32 %v3658_v62, %v968_v35  ;;  %v996_v52 = vmul.f32 0.2, %v972_v49 }
 0x152   : > { %v995_v41 = vmul.f32 0.2, %v969_v38  ;;  %v1012_v54 = vmax.f32 %v972_v49, %v996_v52 }
 0x154   : > { %v1011_v44 = vmax.f32 %v969_v38, %v995_v41 }
 0x155   : > { %v973_v45 = vpop.f32.mrf.mxu2 }
 0x156   : > { %v1022_v47 = vpack.c.bf16 %v1011_v44, %v1010_v46  ;;  %v974_v50 = vadd.f32 %v3658_v62, %v973_v45 }
 0x158   : > { %v997_v53 = vmul.f32 0.2, %v974_v50 }
 0x15a   : > { %v1013_v55 = vmax.f32 %v974_v50, %v997_v53 }
 0x15c   : > { %v1023_v34 = vpack.c.bf16 %v1013_v55, %v1012_v54 }
 0x15d   : > { %v976_v51 = vpop.f32.mrf.mxu2 }
 0x15e   : > { %2739 = vmatmul.msk.bf16.gmra.mxu1 %vm1046_vm1, %v1021_v33  ;;  %v977_v58 = vadd.f32 %v3658_v62, %v976_v51 }
 0x160   : > { %v981_v40 = vpop.f32.mrf.mxu3  ;;  %v998_v60 = vmul.f32 0.2, %v977_v58 }
 0x161   : > { %v982_v1 = vadd.f32 %v3658_v62, %v981_v40 }
 0x162   : > { %v1014_v37 = vmax.f32 %v977_v58, %v998_v60 }
 0x163   : > { %v1000_v4 = vmul.f32 0.2, %v982_v1 }
 0x165   : > { %v978_v56 = vpop.f32.mrf.mxu2  ;;  %v1016_v7 = vmax.f32 %v982_v1, %v1000_v4  ;;  %v3112_v4 = vld [vmem:[%s4484_s5 + $0x74] sm:$0xf] }
 0x166   : > { %v979_v59 = vadd.f32 %v3658_v62, %v978_v56 }
 0x168   : > { %v999_v61 = vmul.f32 0.2, %v979_v59  ;;  %v983_v0 = vpop.f32.mrf.mxu3 }
 0x169   : > { %v984_v2 = vadd.f32 %v3658_v62, %v983_v0  ;;  %v3699_v62 = vld [vmem:[%s4488_s9] ss:$0 sm:$0xff] }
 0x16a   : > { %v1015_v43 = vmax.f32 %v979_v59, %v999_v61 }
 0x16b   : > { %v1001_v5 = vmul.f32 0.2, %v984_v2 }
 0x16c   : > { %v1024_v63 = vpack.c.bf16 %v1015_v43, %v1014_v37 }
 0x16d   : > { %v1017_v8 = vmax.f32 %v984_v2, %v1001_v5  ;;  %v2826_v2 = vld [vmem:[%s4484_s5 + $0x70] sm:$0xf] }
 0x16e   : > { %2740 = vmatmul.msk.bf16.gmra.mxu1 %vm1046_vm1, %v1022_v47  ;;  %v2827_v5 = vor.u32 %v3113_v3, %v2826_v2 }
 0x16f   : > { %v1025_v9 = vpack.c.bf16 %v1017_v8, %v1016_v7  ;;  %v2818_v7 = vld [vmem:[%s4484_s5 + $0x60] sm:$0xf]  ;;  %v3111_v8 = vld [vmem:[%s4484_s5 + $0x64] sm:$0xf0] }
 0x170   : > { %1412 = vmatpush.bf16.msrb.mxu3 %v2827_v5 }
 0x17e   : > { %2741 = vmatmul.msk.bf16.gmra.mxu1 %vm1046_vm1, %v1023_v34 }
 0x18e   : > { %2742 = vmatmul.msk.bf16.gmra.mxu1 %vm1046_vm1, %v1024_v63 }
 0x19e   : > { %2743 = vmatmul.msk.bf16.gmra.mxu1 %vm1046_vm1, %v1025_v9  ;;  %v2831_v9 = vor.u32 %v3112_v4, %v2828_v6  ;;  %v3824_v4 = vld [vmem:[%s4489_s10] ss:$0 sm:$0xff]  ;;  %v3142_v6 = vld [vmem:[%s4485_s6 + $0xe4] sm:$0xf] }
 0x1a0   : > { %1461 = vmatpush.bf16.msrb.mxu0 %v2831_v9 }
 0x1ab   : > { %v1080_v10 = vpop.f32.mrf.mxu1 }
 0x1ac   : > { %v1081_v11 = vadd.f32 %v3699_v62, %v1080_v10  ;;  %v3110_v10 = vld [vmem:[%s4484_s5 + $0x64] sm:$0xf] }
 0x1ae   : > { %v1120_v13 = vmul.f32 0.2, %v1081_v11 }
 0x1b0   : > { %v1136_v16 = vmax.f32 %v1081_v11, %v1120_v13  ;;  %v2820_v11 = vld [vmem:[%s4484_s5 + $0x68] sm:$0xf0] }
 0x1b3   : > { %v1082_v12 = vpop.f32.mrf.mxu1 }
 0x1b4   : > { %v1083_v14 = vadd.f32 %v3699_v62, %v1082_v12  ;;  %v2819_v12 = vor.u32 %v3111_v8, %v2818_v7  ;;  %v2948_v7 = vld [vmem:[%s4485_s6 + $0xf0] sm:$0xf0]  ;;  %v3074_v8 = vld [vmem:[%s4485_s6 + $0x1e0] sm:$0xf] }
 0x1b5   : > { %v2951_v9 = vor.u32 %v3142_v6, %v2948_v7  ;;  %v3130_v6 = vld [vmem:[%s4485_s6 + $0x84] sm:$0xf]  ;;  %v2900_v7 = vld [vmem:[%s4485_s6 + $0x90] sm:$0xf0] }
 0x1b6   : > { %v1121_v15 = vmul.f32 0.2, %v1083_v14  ;;  %1413 = vmatpush.bf16.msrb.mxu3 %v2819_v12 }
 0x1b8   : > { %v1137_v17 = vmax.f32 %v1083_v14, %v1121_v15  ;;  %v2823_v14 = vor.u32 %v3110_v10, %v2820_v11  ;;  %v2810_v15 = vld [vmem:[%s4484_s5 + $0x50] sm:$0xf] }
 0x1b9   : > { %v3176_v10 = vld [vmem:[%s4485_s6 + $0x1ec] sm:$0xf0] }
 0x1ba   : > { %v1152_v18 = vpack.c.bf16 %v1137_v17, %v1136_v16  ;;  %v3109_v16 = vld [vmem:[%s4484_s5 + $0x54] sm:$0xf0]  ;;  %v3108_v17 = vld [vmem:[%s4484_s5 + $0x54] sm:$0xf]  ;;  %1462 = vmatpush.bf16.msrb.mxu0 %v2823_v14  ;;  %v3075_v11 = vor.u32 %v3176_v10, %v3074_v8  ;;  %v3026_v8 = vld [vmem:[%s4485_s6 + $0x180] sm:$0xf] }
 0x1bb   : > { %v1085_v19 = vpop.f32.mrf.mxu1  ;;  %v3164_v10 = vld [vmem:[%s4485_s6 + $0x18c] sm:$0xf0] }
 0x1bc   : > { %2760 = vmatmul.msk.bf16.vlgmr.msrb.gmra.mxu2 %vm1196_vm2, %v1152_v18  ;;  %v1086_v20 = vadd.f32 %v3699_v62, %v1085_v19  ;;  %v2812_v18 = vld [vmem:[%s4484_s5 + $0x58] sm:$0xf0] }
 0x1bd   : > { %2033 = vmatpush.bf16.msra.mxu2 %v3075_v11  ;;  %v3027_v11 = vor.u32 %v3164_v10, %v3026_v8  ;;  %v2850_v10 = vld [vmem:[%s4485_s6 + $0x20] sm:$0xf] }
 0x1be   : > { %v1122_v22 = vmul.f32 0.2, %v1086_v20 }
 0x1c0   : > { %v1138_v25 = vmax.f32 %v1086_v20, %v1122_v22  ;;  %v2811_v20 = vor.u32 %v3109_v16, %v2810_v15  ;;  %v2946_v16 = vld [vmem:[%s4485_s6 + $0xe0] sm:$0xf] }
 0x1c2   : > { %1414 = vmatpush.bf16.msrb.mxu3 %v2811_v20  ;;  %v3076_v20 = vld [vmem:[%s4485_s6 + $0x1f0] sm:$0xf0] }
 0x1c3   : > { %v1087_v21 = vpop.f32.mrf.mxu1 }
 0x1c4   : > { %v1088_v23 = vadd.f32 %v3699_v62, %v1087_v21 }
 0x1c6   : > { %v1123_v24 = vmul.f32 0.2, %v1088_v23 }
 0x1c8   : > { %v1139_v26 = vmax.f32 %v1088_v23, %v1123_v24  ;;  %v2815_v23 = vor.u32 %v3108_v17, %v2812_v18  ;;  %v2802_v24 = vld [vmem:[%s4484_s5 + $0x40] sm:$0xf]  ;;  %v3144_v17 = vld [vmem:[%s4485_s6 + $0xec] sm:$0xf0] }
 0x1c9   : > { %v2947_v18 = vor.u32 %v3144_v17, %v2946_v16  ;;  %v2898_v16 = vld [vmem:[%s4485_s6 + $0x80] sm:$0xf]  ;;  %v3132_v17 = vld [vmem:[%s4485_s6 + $0x8c] sm:$0xf0] }
 0x1ca   : > { %v1153_v27 = vpack.c.bf16 %v1139_v26, %v1138_v25  ;;  %v3107_v25 = vld [vmem:[%s4484_s5 + $0x44] sm:$0xf0]  ;;  %v3106_v26 = vld [vmem:[%s4484_s5 + $0x44] sm:$0xf]  ;;  %1463 = vmatpush.bf16.msrb.mxu0 %v2815_v23 }
 0x1cb   : > { %v1090_v28 = vpop.f32.mrf.mxu1  ;;  %1984 = vmatpush.bf16.msra.mxu1 %v2947_v18  ;;  %v2899_v18 = vor.u32 %v3132_v17, %v2898_v16 }
 0x1cc   : > { %2761 = vmatmul.msk.bf16.gmra.mxu2 %vm1196_vm2, %v1153_v27  ;;  %v1091_v29 = vadd.f32 %v3699_v62, %v1090_v28  ;;  %v2804_v27 = vld [vmem:[%s4484_s5 + $0x48] sm:$0xf0] }
 0x1ce   : > { %v1124_v31 = vmul.f32 0.2, %v1091_v29 }
 0x1d0   : > { %v1140_v35 = vmax.f32 %v1091_v29, %v1124_v31  ;;  %v2803_v29 = vor.u32 %v3107_v25, %v2802_v24 }
 0x1d2   : > { %1415 = vmatpush.bf16.msrb.mxu3 %v2803_v29  ;;  %v3058_v29 = vld [vmem:[%s4485_s6 + $0x1c0] sm:$0xf] }
 0x1d3   : > { %v1092_v30 = vpop.f32.mrf.mxu1 }
 0x1d4   : > { %v1093_v32 = vadd.f32 %v3699_v62, %v1092_v30 }
 0x1d6   : > { %v1125_v33 = vmul.f32 0.2, %v1093_v32 }
 0x1d8   : > { %v1141_v36 = vmax.f32 %v1093_v32, %v1125_v33  ;;  %v2807_v32 = vor.u32 %v3106_v26, %v2804_v27  ;;  %v3138_v27 = vld [vmem:[%s4485_s6 + $0xc4] sm:$0xf] }
 0x1da   : > { %v1154_v38 = vpack.c.bf16 %v1141_v36, %v1140_v35  ;;  %1464 = vmatpush.bf16.msrb.mxu0 %v2807_v32  ;;  %v2794_v36 = vld [vmem:[%s4484_s5 + $0x30] sm:$0xf] }
 0x1db   : > { %v1095_v39 = vpop.f32.mrf.mxu1 }
 0x1dc   : > { %2762 = vmatmul.msk.bf16.gmra.mxu2 %vm1196_vm2, %v1154_v38  ;;  %v1096_v41 = vadd.f32 %v3699_v62, %v1095_v39  ;;  %v3105_v38 = vld [vmem:[%s4484_s5 + $0x34] sm:$0xf0] }
 0x1dd   : > { %v2795_v39 = vor.u32 %v3105_v38, %v2794_v36 }
 0x1de   : > { %v1126_v44 = vmul.f32 0.2, %v1096_v41 }
 0x1df   : > { %1416 = vmatpush.bf16.msrb.mxu3 %v2795_v39  ;;  %v2930_v39 = vld [vmem:[%s4485_s6 + $0xc0] sm:$0xf] }
 0x1e0   : > { %v1142_v47 = vmax.f32 %v1096_v41, %v1126_v44  ;;  %v3104_v41 = vld [vmem:[%s4484_s5 + $0x34] sm:$0xf] }
 0x1e3   : > { %v1097_v42 = vpop.f32.mrf.mxu1 }
 0x1e4   : > { %v1098_v45 = vadd.f32 %v3699_v62, %v1097_v42  ;;  %v2796_v42 = vld [vmem:[%s4484_s5 + $0x38] sm:$0xf0] }
 0x1e6   : > { %v1127_v46 = vmul.f32 0.2, %v1098_v45 }
 0x1e8   : > { %v1143_v48 = vmax.f32 %v1098_v45, %v1127_v46  ;;  %v2799_v45 = vor.u32 %v3104_v41, %v2796_v42  ;;  %v2786_v46 = vld [vmem:[%s4484_s5 + $0x20] sm:$0xf]  ;;  %v3140_v41 = vld [vmem:[%s4485_s6 + $0xcc] sm:$0xf0] }
 0x1e9   : > { %v2931_v42 = vor.u32 %v3140_v41, %v2930_v39  ;;  %v2882_v39 = vld [vmem:[%s4485_s6 + $0x60] sm:$0xf]  ;;  %v3128_v41 = vld [vmem:[%s4485_s6 + $0x6c] sm:$0xf0] }
 0x1ea   : > { %v1155_v49 = vpack.c.bf16 %v1143_v48, %v1142_v47  ;;  %1465 = vmatpush.bf16.msrb.mxu0 %v2799_v45  ;;  %v3103_v47 = vld [vmem:[%s4484_s5 + $0x24] sm:$0xf0]  ;;  %v3102_v48 = vld [vmem:[%s4484_s5 + $0x24] sm:$0xf]  ;;  %v3060_v45 = vld [vmem:[%s4485_s6 + $0x1d0] sm:$0xf0] }
 0x1eb   : > { %v1100_v50 = vpop.f32.mrf.mxu1  ;;  %1985 = vmatpush.bf16.msra.mxu1 %v2931_v42  ;;  %v2883_v42 = vor.u32 %v3128_v41, %v2882_v39 }
 0x1ec   : > { %2763 = vmatmul.msk.bf16.gmra.mxu2 %vm1196_vm2, %v1155_v49  ;;  %v1101_v51 = vadd.f32 %v3699_v62, %v1100_v50  ;;  %v2787_v50 = vor.u32 %v3103_v47, %v2786_v46 }
 0x1ee   : > { %v1128_v53 = vmul.f32 0.2, %v1101_v51  ;;  %1417 = vmatpush.bf16.msrb.mxu3 %v2787_v50 }
 0x1f0   : > { %v1144_v34 = vmax.f32 %v1101_v51, %v1128_v53  ;;  %v2788_v51 = vld [vmem:[%s4484_s5 + $0x28] sm:$0xf0] }
 0x1f3   : > { %v1102_v52 = vpop.f32.mrf.mxu1 }
 0x1f4   : > { %v1103_v54 = vadd.f32 %v3699_v62, %v1102_v52 }
 0x1f6   : > { %v1129_v55 = vmul.f32 0.2, %v1103_v54 }
 0x1f8   : > { %v1145_v56 = vmax.f32 %v1103_v54, %v1129_v55  ;;  %v2791_v54 = vor.u32 %v3102_v48, %v2788_v51 }
 0x1fa   : > { %v1156_v57 = vpack.c.bf16 %v1145_v56, %v1144_v34  ;;  %1466 = vmatpush.bf16.msrb.mxu0 %v2791_v54  ;;  %v2778_v34 = vld [vmem:[%s4484_s5 + $0x10] sm:$0xf]  ;;  %v3101_v56 = vld [vmem:[%s4484_s5 + $0x14] sm:$0xf0]  ;;  %v3042_v54 = vld [vmem:[%s4485_s6 + $0x1a0] sm:$0xf] }
 0x1fb   : > { %v1105_v58 = vpop.f32.mrf.mxu1 }
 0x1fc   : > { %2764 = vmatmul.msk.bf16.gmra.mxu2 %vm1196_vm2, %v1156_v57  ;;  %v1106_v59 = vadd.f32 %v3699_v62, %v1105_v58  ;;  %v2779_v57 = vor.u32 %v3101_v56, %v2778_v34  ;;  %v3100_v58 = vld [vmem:[%s4484_s5 + $0x14] sm:$0xf]  ;;  %v3168_v34 = vld [vmem:[%s4485_s6 + $0x1ac] sm:$0xf0] }
 0x1fd   : > { %v3043_v56 = vor.u32 %v3168_v34, %v3042_v54  ;;  %v2994_v54 = vld [vmem:[%s4485_s6 + $0x140] sm:$0xf]  ;;  %v3156_v34 = vld [vmem:[%s4485_s6 + $0x14c] sm:$0xf0] }
 0x1fe   : > { %v1130_v60 = vmul.f32 0.2, %v1106_v59  ;;  %1418 = vmatpush.bf16.msrb.mxu3 %v2779_v57 }
 0x200   : > { %v1146_v43 = vmax.f32 %v1106_v59, %v1130_v60 }
 0x203   : > { %v1107_v40 = vpop.f32.mrf.mxu1 }
 0x204   : > { %v1108_v61 = vadd.f32 %v3699_v62, %v1107_v40 }
 0x206   : > { %v1131_v37 = vmul.f32 0.2, %v1108_v61 }
 0x208   : > { %v1147_v63 = vmax.f32 %v1108_v61, %v1131_v37  ;;  %v2770_v37 = vld [vmem:[%s4484_s5] sm:$0xf] }
 0x20a   : > { %v1157_v0 = vpack.c.bf16 %v1147_v63, %v1146_v43  ;;  %v3099_v43 = vld [vmem:[%s4484_s5 + $0x4] sm:$0xf0]  ;;  %v3098_v63 = vld [vmem:[%s4484_s5 + $0x4] sm:$0xf] }
 0x20b   : > { %v1110_v1 = vpop.f32.mrf.mxu1 }
 0x20c   : > { %2765 = vmatmul.msk.bf16.gmra.mxu2 %vm1196_vm2, %v1157_v0  ;;  %v1111_v13 = vadd.f32 %v3699_v62, %v1110_v1  ;;  %v2771_v0 = vor.u32 %v3099_v43, %v2770_v37  ;;  %v2772_v1 = vld [vmem:[%s4484_s5 + $0x8] sm:$0xf0]  ;;  %v3166_v37 = vld [vmem:[%s4485_s6 + $0x1a4] sm:$0xf]  ;;  %v3044_v43 = vld [vmem:[%s4485_s6 + $0x1b0] sm:$0xf0] }
 0x20d   : > { %v2775_v2 = vor.u32 %v3098_v63, %v2772_v1  ;;  %v3047_v1 = vor.u32 %v3166_v37, %v3044_v43  ;;  %v3154_v37 = vld [vmem:[%s4485_s6 + $0x144] sm:$0xf]  ;;  %v2996_v43 = vld [vmem:[%s4485_s6 + $0x150] sm:$0xf0] }
 0x20e   : > { %v1132_v21 = vmul.f32 0.2, %v1111_v13  ;;  %1419 = vmatpush.bf16.msrb.mxu3 %v2771_v0 }
 0x210   : > { %v1148_v30 = vmax.f32 %v1111_v13, %v1132_v21 }
 0x212   : > { %2082 = vmatpush.bf16.msra.mxu3 %v2951_v9  ;;  %v2903_v9 = vor.u32 %v3130_v6, %v2900_v7  ;;  %v2852_v6 = vld [vmem:[%s4485_s6 + $0x30] sm:$0xf0]  ;;  %v2978_v7 = vld [vmem:[%s4485_s6 + $0x120] sm:$0xf] }
 0x213   : > { %v1112_v19 = vpop.f32.mrf.mxu1 }
 0x214   : > { %v1113_v22 = vadd.f32 %v3699_v62, %v1112_v19  ;;  %v3174_v19 = vld [vmem:[%s4485_s6 + $0x1e4] sm:$0xf] }
 0x215   : > { %v3079_v23 = vor.u32 %v3174_v19, %v3076_v20  ;;  %v3162_v19 = vld [vmem:[%s4485_s6 + $0x184] sm:$0xf]  ;;  %v3028_v20 = vld [vmem:[%s4485_s6 + $0x190] sm:$0xf0] }
 0x216   : > { %v1133_v28 = vmul.f32 0.2, %v1113_v22 }
 0x218   : > { %v1149_v31 = vmax.f32 %v1113_v22, %v1133_v28  ;;  %v2932_v28 = vld [vmem:[%s4485_s6 + $0xd0] sm:$0xf0] }
 0x21a   : > { %v1158_v33 = vpack.c.bf16 %v1149_v31, %v1148_v30  ;;  %v2935_v30 = vor.u32 %v3138_v27, %v2932_v28  ;;  %v3172_v31 = vld [vmem:[%s4485_s6 + $0x1cc] sm:$0xf0]  ;;  %v3126_v27 = vld [vmem:[%s4485_s6 + $0x64] sm:$0xf]  ;;  %v2884_v28 = vld [vmem:[%s4485_s6 + $0x70] sm:$0xf0] }
 0x21b   : > { %v1115_v35 = vpop.f32.mrf.mxu1  ;;  %v3059_v32 = vor.u32 %v3172_v31, %v3058_v29  ;;  %v3010_v29 = vld [vmem:[%s4485_s6 + $0x160] sm:$0xf]  ;;  %v3160_v31 = vld [vmem:[%s4485_s6 + $0x16c] sm:$0xf0] }
 0x21c   : > { %2766 = vmatmul.msk.bf16.gmra.mxu2 %vm1196_vm2, %v1158_v33  ;;  %v1116_v44 = vadd.f32 %v3699_v62, %v1115_v35  ;;  %2083 = vmatpush.bf16.msra.mxu3 %v2935_v30  ;;  %v2887_v30 = vor.u32 %v3126_v27, %v2884_v28 }
 0x21d   : > { %2034 = vmatpush.bf16.msra.mxu2 %v3059_v32  ;;  %v3011_v32 = vor.u32 %v3160_v31, %v3010_v29  ;;  %v2836_v31 = vld [vmem:[%s4485_s6 + $0x10] sm:$0xf0] }
 0x21e   : > { %v1134_v52 = vmul.f32 0.2, %v1116_v44 }
 0x220   : > { %v1150_v59 = vmax.f32 %v1116_v44, %v1134_v52  ;;  %v3170_v44 = vld [vmem:[%s4485_s6 + $0x1c4] sm:$0xf] }
 0x221   : > { %v3063_v48 = vor.u32 %v3170_v44, %v3060_v45  ;;  %v3134_v52 = vld [vmem:[%s4485_s6 + $0xa4] sm:$0xf]  ;;  %2035 = vmatpush.bf16.msra.mxu2 %v3043_v56  ;;  %v3012_v45 = vld [vmem:[%s4485_s6 + $0x170] sm:$0xf0]  ;;  %v2995_v56 = vor.u32 %v3156_v34, %v2994_v54  ;;  %v3177_v54 = vld [vmem:[%s4485_s6 + $0x1f4] sm:$0xf0] }
 0x222   : > { %v3158_v44 = vld [vmem:[%s4485_s6 + $0x164] sm:$0xf] }
 0x223   : > { %v1117_v49 = vpop.f32.mrf.mxu1 }
 0x224   : > { %v1118_v53 = vadd.f32 %v3699_v62, %v1117_v49  ;;  %v2780_v62 = vld [vmem:[%s4484_s5 + $0x18] sm:$0xf0] }
 0x225   : > { %v2783_v60 = vor.u32 %v3100_v58, %v2780_v62  ;;  %2036 = vmatpush.bf16.msra.mxu2 %v3027_v11  ;;  %v3120_v11 = vld [vmem:[%s4485_s6 + $0x2c] sm:$0xf0] }
 0x226   : > { %v1135_v55 = vmul.f32 0.2, %v1118_v53 }
 0x227   : > { %1467 = vmatpush.bf16.msrb.mxu0 %v2783_v60  ;;  %v3136_v60 = vld [vmem:[%s4485_s6 + $0xac] sm:$0xf0] }
 0x228   : > { %v1151_v40 = vmax.f32 %v1118_v53, %v1135_v55  ;;  %v2916_v53 = vld [vmem:[%s4485_s6 + $0xb0] sm:$0xf0] }
 0x229   : > { %v2919_v55 = vor.u32 %v3134_v52, %v2916_v53  ;;  %2037 = vmatpush.bf16.msra.mxu2 %v3011_v32  ;;  %v3122_v52 = vld [vmem:[%s4485_s6 + $0x44] sm:$0xf]  ;;  %v2868_v53 = vld [vmem:[%s4485_s6 + $0x50] sm:$0xf0]  ;;  %v2962_v32 = vld [vmem:[%s4485_s6 + $0x100] sm:$0xf] }
 0x22a   : > { %v1159_v61 = vpack.c.bf16 %v1151_v40, %v1150_v59  ;;  %v2914_v40 = vld [vmem:[%s4485_s6 + $0xa0] sm:$0xf] }
 0x22b   : > { %1468 = vmatpush.bf16.msrb.mxu0 %v2775_v2  ;;  %2084 = vmatpush.bf16.msra.mxu3 %v2919_v55  ;;  %v2871_v55 = vor.u32 %v3122_v52, %v2868_v53  ;;  %v1326_v52 = vld [vmem:[%s4490_s11] sm:$0x3]  ;;  %v3082_v53 = vld [vmem:[%s4485_s6 + $0x1e8] sm:$0xf] }
 0x22c   : > { %2767 = vmatmul.msk.bf16.gmra.mxu2 %vm1196_vm2, %v1159_v61  ;;  %v2915_v61 = vor.u32 %v3136_v60, %v2914_v40  ;;  %v2866_v40 = vld [vmem:[%s4485_s6 + $0x40] sm:$0xf]  ;;  %v3124_v60 = vld [vmem:[%s4485_s6 + $0x4c] sm:$0xf0] }
 0x22d   : > { %2038 = vmatpush.bf16.msra.mxu2 %v2995_v56  ;;  %v3083_v56 = vor.u32 %v3177_v54, %v3082_v53 }
 0x22e   : > { %1986 = vmatpush.bf16.msra.mxu1 %v2915_v61  ;;  %v2867_v61 = vor.u32 %v3124_v60, %v2866_v40  ;;  %v3175_v40 = vld [vmem:[%s4485_s6 + $0x1ec] sm:$0xf]  ;;  %v3084_v60 = vld [vmem:[%s4485_s6 + $0x1f8] sm:$0xf0] }
 0x22f   : > { %2131 = vmatpush.bf16.msra.mxu0 %v3079_v23  ;;  %2085 = vmatpush.bf16.msra.mxu3 %v2903_v9  ;;  %v3031_v23 = vor.u32 %v3162_v19, %v3028_v20  ;;  %v3152_v9 = vld [vmem:[%s4485_s6 + $0x12c] sm:$0xf0] }
 0x232   : > { %1987 = vmatpush.bf16.msra.mxu1 %v2899_v18 }
 0x233   : > { %2132 = vmatpush.bf16.msra.mxu0 %v3063_v48  ;;  %2086 = vmatpush.bf16.msra.mxu3 %v2887_v30  ;;  %v3015_v48 = vor.u32 %v3158_v44, %v3012_v45  ;;  %v3114_v30 = vld [vmem:[%s4485_s6 + $0x4] sm:$0xf]  ;;  %v2834_v45 = vld [vmem:[%s4485_s6] sm:$0xf] }
 0x236   : > { %1988 = vmatpush.bf16.msra.mxu1 %v2883_v42 }
 0x237   : > { %2133 = vmatpush.bf16.msra.mxu0 %v3047_v1  ;;  %2087 = vmatpush.bf16.msra.mxu3 %v2871_v55  ;;  %v2999_v1 = vor.u32 %v3154_v37, %v2996_v43  ;;  %v2954_v55 = vld [vmem:[%s4485_s6 + $0xe8] sm:$0xf]  ;;  %v3087_v43 = vor.u32 %v3175_v40, %v3084_v60 }
 0x23a   : > { %1989 = vmatpush.bf16.msra.mxu1 %v2867_v61  ;;  %v4064_v61 = vperm.slane %v1326_v52, 0 }
 0x23b   : > { %2134 = vmatpush.bf16.msra.mxu0 %v3031_v23 }
 0x23f   : > { %v1230_v3 = vpop.f32.mrf.mxu2  ;;  %2135 = vmatpush.bf16.msra.mxu0 %v3015_v48 }
 0x240   : > { %v1231_v5 = vadd.f32 %v3824_v4, %v1230_v3 }
 0x242   : > { %v1270_v13 = vmul.f32 0.2, %v1231_v5 }
 0x243   : > { %2136 = vmatpush.bf16.msra.mxu0 %v2999_v1 }
 0x244   : > { %v1286_v21 = vmax.f32 %v1231_v5, %v1270_v13 }
 0x247   : > { %v1232_v12 = vpop.f32.mrf.mxu2 }
 0x248   : > { %v1233_v14 = vadd.f32 %v3824_v4, %v1232_v12 }
 0x24a   : > { %v1271_v15 = vmul.f32 0.2, %v1233_v14 }
 0x24c   : > { %v1287_v22 = vmax.f32 %v1233_v14, %v1271_v15 }
 0x24e   : > { %v1302_v24 = vpack.c.bf16 %v1287_v22, %v1286_v21 }
 0x24f   : > { %v1235_v25 = vpop.f32.mrf.mxu2 }
 0x250   : > { %1420 = vmatmul.bf16.vlgmr.msrb.gmra.mxu3 %v1302_v24  ;;  %1469 = vmatmul.bf16.vlgmr.msrb.gmra.mxu0 %v1302_v24  ;;  %v1236_v26 = vadd.f32 %v3824_v4, %v1235_v25 }
 0x252   : > { %v1272_v35 = vmul.f32 0.2, %v1236_v26 }
 0x254   : > { %v1288_v46 = vmax.f32 %v1236_v26, %v1272_v35 }
 0x257   : > { %v1237_v33 = vpop.f32.mrf.mxu2 }
 0x258   : > { %v1238_v36 = vadd.f32 %v3824_v4, %v1237_v33 }
 0x25a   : > { %v1273_v38 = vmul.f32 0.2, %v1238_v36 }
 0x25c   : > { %v1289_v47 = vmax.f32 %v1238_v36, %v1273_v38 }
 0x25e   : > { %v1303_v49 = vpack.c.bf16 %v1289_v47, %v1288_v46 }
 0x25f   : > { %v1240_v50 = vpop.f32.mrf.mxu2 }
 0x260   : > { %1425 = vmatmul.bf16.gmra.mxu3 %v1303_v49  ;;  %1474 = vmatmul.bf16.gmra.mxu0 %v1303_v49  ;;  %v1241_v51 = vadd.f32 %v3824_v4, %v1240_v50 }
 0x262   : > { %v1274_v58 = vmul.f32 0.2, %v1241_v51 }
 0x264   : > { %v1290_v63 = vmax.f32 %v1241_v51, %v1274_v58 }
 0x267   : > { %v1242_v57 = vpop.f32.mrf.mxu2 }
 0x268   : > { %v1243_v62 = vadd.f32 %v3824_v4, %v1242_v57 }
 0x26a   : > { %v1275_v59 = vmul.f32 0.2, %v1243_v62 }
 0x26c   : > { %v1291_v0 = vmax.f32 %v1243_v62, %v1275_v59 }
 0x26e   : > { %v1304_v2 = vpack.c.bf16 %v1291_v0, %v1290_v63 }
 0x26f   : > { %v1245_v3 = vpop.f32.mrf.mxu2 }
 0x270   : > { %1430 = vmatmul.bf16.gmra.mxu3 %v1304_v2  ;;  %1479 = vmatmul.bf16.gmra.mxu0 %v1304_v2  ;;  %v1246_v5 = vadd.f32 %v3824_v4, %v1245_v3 }
 0x272   : > { %v1276_v13 = vmul.f32 0.2, %v1246_v5 }
 0x274   : > { %v1292_v21 = vmax.f32 %v1246_v5, %v1276_v13  ;;  %v3118_v5 = vld [vmem:[%s4485_s6 + $0x24] sm:$0xf]  ;;  %v2851_v13 = vor.u32 %v3120_v11, %v2850_v10 }
 0x275   : > { %v2855_v8 = vor.u32 %v3118_v5, %v2852_v6  ;;  %v3139_v5 = vld [vmem:[%s4485_s6 + $0xcc] sm:$0xf]  ;;  %v2940_v6 = vld [vmem:[%s4485_s6 + $0xd8] sm:$0xf0] }
 0x276   : > { %1990 = vmatpush.bf16.msra.mxu1 %v2851_v13 }
 0x277   : > { %v1247_v12 = vpop.f32.mrf.mxu2  ;;  %2088 = vmatpush.bf16.msra.mxu3 %v2855_v8 }
 0x278   : > { %v1248_v14 = vadd.f32 %v3824_v4, %v1247_v12  ;;  %v2979_v12 = vor.u32 %v3152_v9, %v2978_v7  ;;  %v2943_v7 = vor.u32 %v3139_v5, %v2940_v6 }
 0x27a   : > { %v1277_v15 = vmul.f32 0.2, %v1248_v14  ;;  %2039 = vmatpush.bf16.msra.mxu2 %v2979_v12 }
 0x27c   : > { %v1293_v22 = vmax.f32 %v1248_v14, %v1277_v15  ;;  %v3150_v14 = vld [vmem:[%s4485_s6 + $0x124] sm:$0xf]  ;;  %v2980_v15 = vld [vmem:[%s4485_s6 + $0x130] sm:$0xf0] }
 0x27d   : > { %v2983_v16 = vor.u32 %v3150_v14, %v2980_v15  ;;  %v3066_v14 = vld [vmem:[%s4485_s6 + $0x1c8] sm:$0xf]  ;;  %v3173_v15 = vld [vmem:[%s4485_s6 + $0x1d4] sm:$0xf0] }
 0x27e   : > { %v1305_v24 = vpack.c.bf16 %v1293_v22, %v1292_v21 }
 0x27f   : > { %v1250_v25 = vpop.f32.mrf.mxu2  ;;  %2137 = vmatpush.bf16.msra.mxu0 %v2983_v16  ;;  %v2938_v16 = vld [vmem:[%s4485_s6 + $0xc8] sm:$0xf] }
 0x280   : > { %1435 = vmatmul.bf16.gmra.mxu3 %v1305_v24  ;;  %1484 = vmatmul.bf16.gmra.mxu0 %v1305_v24  ;;  %v1251_v26 = vadd.f32 %v3824_v4, %v1250_v25 }
 0x282   : > { %v1278_v35 = vmul.f32 0.2, %v1251_v26 }
 0x284   : > { %v1294_v46 = vmax.f32 %v1251_v26, %v1278_v35  ;;  %v3148_v35 = vld [vmem:[%s4485_s6 + $0x10c] sm:$0xf0] }
 0x285   : > { %v2963_v39 = vor.u32 %v3148_v35, %v2962_v32 }
 0x287   : > { %v1252_v33 = vpop.f32.mrf.mxu2  ;;  %2040 = vmatpush.bf16.msra.mxu2 %v2963_v39 }
 0x288   : > { %v1253_v36 = vadd.f32 %v3824_v4, %v1252_v33  ;;  %v2839_v33 = vor.u32 %v3114_v30, %v2836_v31 }
 0x28a   : > { %v1279_v38 = vmul.f32 0.2, %v1253_v36  ;;  %2089 = vmatpush.bf16.msra.mxu3 %v2839_v33 }
 0x28b   : > { %2229 = vmatpush.bf16.msrb.mxu2 %v3083_v56 }
 0x28c   : > { %v1295_v47 = vmax.f32 %v1253_v36, %v1279_v38  ;;  %v2964_v36 = vld [vmem:[%s4485_s6 + $0x110] sm:$0xf0] }
 0x28e   : > { %v1306_v49 = vpack.c.bf16 %v1295_v47, %v1294_v46  ;;  %v3116_v46 = vld [vmem:[%s4485_s6 + $0xc] sm:$0xf0] }
 0x28f   : > { %v1255_v50 = vpop.f32.mrf.mxu2  ;;  %v2835_v47 = vor.u32 %v3116_v46, %v2834_v45 }
 0x290   : > { %1440 = vmatmul.bf16.gmra.mxu3 %v1306_v49  ;;  %1489 = vmatmul.bf16.gmra.mxu0 %v1306_v49  ;;  %v1256_v51 = vadd.f32 %v3824_v4, %v1255_v50  ;;  %v3143_v49 = vld [vmem:[%s4485_s6 + $0xec] sm:$0xf]  ;;  %v2956_v50 = vld [vmem:[%s4485_s6 + $0xf8] sm:$0xf0] }
 0x291   : > { %1991 = vmatpush.bf16.msra.mxu1 %v2835_v47  ;;  %v3050_v47 = vld [vmem:[%s4485_s6 + $0x1a8] sm:$0xf] }
 0x292   : > { %v1280_v58 = vmul.f32 0.2, %v1256_v51 }
 0x294   : > { %v1296_v63 = vmax.f32 %v1256_v51, %v1280_v58  ;;  %v2959_v51 = vor.u32 %v3143_v49, %v2956_v50  ;;  %v4055_v58 = vperm.slane %v1326_v52, 1  ;;  %v2922_v49 = vld [vmem:[%s4485_s6 + $0xa8] sm:$0xf]  ;;  %v3137_v52 = vld [vmem:[%s4485_s6 + $0xb4] sm:$0xf0] }
 0x295   : > { %v2923_v54 = vor.u32 %v3137_v52, %v2922_v49  ;;  %v3161_v49 = vld [vmem:[%s4485_s6 + $0x174] sm:$0xf0] }
 0x296   : > { %2278 = vmatpush.bf16.msrb.mxu3 %v2959_v51 }
 0x297   : > { %v1257_v57 = vpop.f32.mrf.mxu2 }
 0x298   : > { %v1258_v62 = vadd.f32 %v3824_v4, %v1257_v57  ;;  %v3145_v57 = vld [vmem:[%s4485_s6 + $0xf4] sm:$0xf0] }
 0x29a   : > { %v1281_v59 = vmul.f32 0.2, %v1258_v62  ;;  %2279 = vmatpush.bf16.msrb.mxu3 %v2943_v7 }
 0x29c   : > { %v1297_v0 = vmax.f32 %v1258_v62, %v1281_v59  ;;  %v2955_v62 = vor.u32 %v3145_v57, %v2954_v55 }
 0x29e   : > { %v1307_v2 = vpack.c.bf16 %v1297_v0, %v1296_v63  ;;  %2180 = vmatpush.bf16.msrb.mxu1 %v2955_v62  ;;  %v3167_v62 = vld [vmem:[%s4485_s6 + $0x1ac] sm:$0xf] }
 0x29f   : > { %v1260_v3 = vpop.f32.mrf.mxu2 }
 0x2a0   : > { %1445 = vmatmul.bf16.gmra.mxu3 %v1307_v2  ;;  %1494 = vmatmul.bf16.gmra.mxu0 %v1307_v2  ;;  %v1261_v17 = vadd.f32 %v3824_v4, %v1260_v3 }
 0x2a2   : > { %v1282_v19 = vmul.f32 0.2, %v1261_v17 }
 0x2a4   : > { %v1298_v22 = vmax.f32 %v1261_v17, %v1282_v19  ;;  %v3141_v19 = vld [vmem:[%s4485_s6 + $0xd4] sm:$0xf0] }
 0x2a7   : > { %v1262_v18 = vpop.f32.mrf.mxu2 }
 0x2a8   : > { %v1263_v20 = vadd.f32 %v3824_v4, %v1262_v18  ;;  %v3067_v18 = vor.u32 %v3173_v15, %v3066_v14  ;;  %v3165_v14 = vld [vmem:[%s4485_s6 + $0x194] sm:$0xf0]  ;;  %v2906_v15 = vld [vmem:[%s4485_s6 + $0x88] sm:$0xf] }
 0x2aa   : > { %v1283_v21 = vmul.f32 0.2, %v1263_v20  ;;  %2230 = vmatpush.bf16.msrb.mxu2 %v3067_v18  ;;  %v3133_v18 = vld [vmem:[%s4485_s6 + $0x94] sm:$0xf0] }
 0x2ac   : > { %v1299_v23 = vmax.f32 %v1263_v20, %v1283_v21  ;;  %v2939_v21 = vor.u32 %v3141_v19, %v2938_v16 }
 0x2ae   : > { %v1308_v24 = vpack.c.bf16 %v1299_v23, %v1298_v22  ;;  %2181 = vmatpush.bf16.msrb.mxu1 %v2939_v21 }
 0x2af   : > { %v1265_v25 = vpop.f32.mrf.mxu2 }
 0x2b0   : > { %1450 = vmatmul.bf16.gmra.mxu3 %v1308_v24  ;;  %1499 = vmatmul.bf16.gmra.mxu0 %v1308_v24  ;;  %v1266_v26 = vadd.f32 %v3824_v4, %v1265_v25 }
 0x2b2   : > { %v1284_v27 = vmul.f32 0.2, %v1266_v26  ;;  %2182 = vmatpush.bf16.msrb.mxu1 %v2923_v54 }
 0x2b4   : > { %v1300_v42 = vmax.f32 %v1266_v26, %v1284_v27  ;;  %v3171_v26 = vld [vmem:[%s4485_s6 + $0x1cc] sm:$0xf]  ;;  %v3068_v27 = vld [vmem:[%s4485_s6 + $0x1d8] sm:$0xf0] }
 0x2b7   : > { %v1267_v28 = vpop.f32.mrf.mxu2 }
 0x2b8   : > { %v1268_v29 = vadd.f32 %v3824_v4, %v1267_v28  ;;  %v3146_v4 = vld [vmem:[%s4485_s6 + $0x104] sm:$0xf] }
 0x2b9   : > { %v2967_v41 = vor.u32 %v3146_v4, %v2964_v36  ;;  %v3135_v4 = vld [vmem:[%s4485_s6 + $0xac] sm:$0xf]  ;;  %v2924_v36 = vld [vmem:[%s4485_s6 + $0xb8] sm:$0xf0] }
 0x2ba   : > { %v1285_v38 = vmul.f32 0.2, %v1268_v29 }
 0x2bb   : > { %2138 = vmatpush.bf16.msra.mxu0 %v2967_v41 }
 0x2bc   : > { %v1301_v44 = vmax.f32 %v1268_v29, %v1285_v38  ;;  %v3071_v29 = vor.u32 %v3171_v26, %v3068_v27  ;;  %v2927_v38 = vor.u32 %v3135_v4, %v2924_v36  ;;  %v3163_v26 = vld [vmem:[%s4485_s6 + $0x18c] sm:$0xf]  ;;  %v3036_v27 = vld [vmem:[%s4485_s6 + $0x198] sm:$0xf0] }
 0x2bd   : > { %v3127_v4 = vld [vmem:[%s4485_s6 + $0x6c] sm:$0xf]  ;;  %v2892_v36 = vld [vmem:[%s4485_s6 + $0x78] sm:$0xf0] }
 0x2be   : > { %v1309_v48 = vpack.c.bf16 %v1301_v44, %v1300_v42  ;;  %2280 = vmatpush.bf16.msrb.mxu3 %v2927_v38  ;;  %v2895_v38 = vor.u32 %v3127_v4, %v2892_v36 }
 0x2bf   : > { %2327 = vmatpush.bf16.msrb.mxu0 %v3087_v43 }
 0x2c0   : > { %1455 = vmatmul.bf16.gmra.mxu3 %v1309_v48  ;;  %1504 = vmatmul.bf16.gmra.mxu0 %v1309_v48  ;;  %v3169_v48 = vld [vmem:[%s4485_s6 + $0x1b4] sm:$0xf0] }
 0x2c1   : > { %v3051_v51 = vor.u32 %v3169_v48, %v3050_v47  ;;  %v3018_v48 = vld [vmem:[%s4485_s6 + $0x168] sm:$0xf] }
 0x2c2   : > { %v3019_v52 = vor.u32 %v3161_v49, %v3018_v48 }
 0x2c3   : > { %2328 = vmatpush.bf16.msrb.mxu0 %v3071_v29  ;;  %2231 = vmatpush.bf16.msrb.mxu2 %v3051_v51  ;;  %v3039_v29 = vor.u32 %v3163_v26, %v3036_v27 }
 0x2cd   : > { %v1470_v34 = vpop.f32.mrf.mxu0 }
 0x2ce   : > { %v1471_v59 = vadd.f32 %v1470_v34, %v4055_v58 }
 0x2d0   : > { %v1511_v0 = vmul.f32 0.2, %v1471_v59 }
 0x2d2   : > { %v1543_v8 = vmax.f32 %v1471_v59, %v1511_v0  ;;  %v3052_v59 = vld [vmem:[%s4485_s6 + $0x1b8] sm:$0xf0] }
 0x2d3   : > { %v1421_v37 = vpop.f32.mrf.mxu3  ;;  %v3055_v60 = vor.u32 %v3167_v62, %v3052_v59 }
 0x2d4   : > { %v1422_v2 = vadd.f32 %v1421_v37, %v4064_v61 }
 0x2d5   : > { %v1472_v63 = vpop.f32.mrf.mxu0  ;;  %2329 = vmatpush.bf16.msrb.mxu0 %v3055_v60  ;;  %v3020_v60 = vld [vmem:[%s4485_s6 + $0x178] sm:$0xf0] }
 0x2d6   : > { %v1473_v1 = vadd.f32 %v1472_v63, %v4055_v58  ;;  %v1510_v10 = vmul.f32 0.2, %v1422_v2 }
 0x2d8   : > { %v1513_v3 = vmul.f32 0.2, %v1473_v1  ;;  %v1542_v22 = vmax.f32 %v1422_v2, %v1510_v10  ;;  %v3131_v2 = vld [vmem:[%s4485_s6 + $0x8c] sm:$0xf] }
 0x2d9   : > { %2330 = vmatpush.bf16.msrb.mxu0 %v3039_v29 }
 0x2da   : > { %v1545_v9 = vmax.f32 %v1473_v1, %v1513_v3  ;;  %v2908_v3 = vld [vmem:[%s4485_s6 + $0x98] sm:$0xf0] }
 0x2db   : > { %v1423_v11 = vpop.f32.mrf.mxu3  ;;  %v2911_v5 = vor.u32 %v3131_v2, %v2908_v3 }
 0x2dc   : > { %v4074_v12 = vpack.c.bf16 %v1545_v9, %v1543_v8  ;;  %v1424_v13 = vadd.f32 %v1423_v11, %v4064_v61 }
 0x2dd   : > { %v1475_v17 = vpop.f32.mrf.mxu0  ;;  %2281 = vmatpush.bf16.msrb.mxu3 %v2911_v5  ;;  %v3123_v5 = vld [vmem:[%s4485_s6 + $0x4c] sm:$0xf] }
 0x2de   : > { %v1512_v20 = vmul.f32 0.2, %v1424_v13  ;;  %2041 = vmatmul.bf16.vlgmr.msra.gmra.mxu2 %v4074_v12  ;;  %2139 = vmatmul.bf16.vlgmr.msra.gmra.mxu0 %v4074_v12  ;;  %v1476_v25 = vadd.f32 %v1475_v17, %v4055_v58 }
 0x2e0   : > { %v1544_v23 = vmax.f32 %v1424_v13, %v1512_v20  ;;  %v1515_v31 = vmul.f32 0.2, %v1476_v25  ;;  %v3034_v13 = vld [vmem:[%s4485_s6 + $0x188] sm:$0xf]  ;;  %v2907_v20 = vor.u32 %v3133_v18, %v2906_v15 }
 0x2e1   : > { %v3035_v17 = vor.u32 %v3165_v14, %v3034_v13  ;;  %2282 = vmatpush.bf16.msrb.mxu3 %v2895_v38  ;;  %v2874_v18 = vld [vmem:[%s4485_s6 + $0x48] sm:$0xf] }
 0x2e2   : > { %v4091_v24 = vpack.c.bf16 %v1544_v23, %v1542_v22  ;;  %v1547_v39 = vmax.f32 %v1476_v25, %v1515_v31  ;;  %2183 = vmatpush.bf16.msrb.mxu1 %v2907_v20 }
 0x2e3   : > { %v1426_v28 = vpop.f32.mrf.mxu3  ;;  %2232 = vmatpush.bf16.msrb.mxu2 %v3035_v17  ;;  %v3157_v17 = vld [vmem:[%s4485_s6 + $0x154] sm:$0xf0] }
 0x2e4   : > { %1992 = vmatmul.bf16.vlgmr.msra.gmra.mxu1 %v4091_v24  ;;  %2090 = vmatmul.bf16.vlgmr.msra.gmra.mxu3 %v4091_v24  ;;  %v1427_v33 = vadd.f32 %v1426_v28, %v4064_v61 }
 0x2e5   : > { %v1477_v30 = vpop.f32.mrf.mxu0 }
 0x2e6   : > { %v1478_v32 = vadd.f32 %v1477_v30, %v4055_v58  ;;  %v1514_v42 = vmul.f32 0.2, %v1427_v33 }
 0x2e7   : > { %2233 = vmatpush.bf16.msrb.mxu2 %v3019_v52 }
 0x2e8   : > { %v1517_v35 = vmul.f32 0.2, %v1478_v32  ;;  %v1546_v55 = vmax.f32 %v1427_v33, %v1514_v42 }
 0x2ea   : > { %v1549_v41 = vmax.f32 %v1478_v32, %v1517_v35 }
 0x2eb   : > { %v1428_v44 = vpop.f32.mrf.mxu3 }
 0x2ec   : > { %v4110_v45 = vpack.c.bf16 %v1549_v41, %v1547_v39  ;;  %v1429_v46 = vadd.f32 %v1428_v44, %v4064_v61 }
 0x2ed   : > { %v1480_v50 = vpop.f32.mrf.mxu0 }
 0x2ee   : > { %v1516_v53 = vmul.f32 0.2, %v1429_v46  ;;  %2046 = vmatmul.bf16.gmra.mxu2 %v4110_v45  ;;  %2144 = vmatmul.bf16.gmra.mxu0 %v4110_v45  ;;  %v1481_v57 = vadd.f32 %v1480_v50, %v4055_v58  ;;  %v2890_v50 = vld [vmem:[%s4485_s6 + $0x68] sm:$0xf] }
 0x2f0   : > { %v1548_v34 = vmax.f32 %v1429_v46, %v1516_v53  ;;  %v1519_v43 = vmul.f32 0.2, %v1481_v57  ;;  %v3129_v53 = vld [vmem:[%s4485_s6 + $0x74] sm:$0xf0] }
 0x2f2   : > { %v4127_v56 = vpack.c.bf16 %v1548_v34, %v1546_v55  ;;  %v1551_v6 = vmax.f32 %v1481_v57, %v1519_v43  ;;  %v2891_v55 = vor.u32 %v3129_v53, %v2890_v50  ;;  %v2986_v53 = vld [vmem:[%s4485_s6 + $0x128] sm:$0xf] }
 0x2f3   : > { %v1431_v40 = vpop.f32.mrf.mxu3 }
 0x2f4   : > { %1997 = vmatmul.bf16.gmra.mxu1 %v4127_v56  ;;  %2095 = vmatmul.bf16.gmra.mxu3 %v4127_v56  ;;  %v1432_v0 = vadd.f32 %v1431_v40, %v4064_v61  ;;  %v3159_v40 = vld [vmem:[%s4485_s6 + $0x16c] sm:$0xf] }
 0x2f5   : > { %v1482_v37 = vpop.f32.mrf.mxu0  ;;  %2184 = vmatpush.bf16.msrb.mxu1 %v2891_v55  ;;  %v3023_v43 = vor.u32 %v3159_v40, %v3020_v60  ;;  %v2858_v55 = vld [vmem:[%s4485_s6 + $0x28] sm:$0xf] }
 0x2f6   : > { %v1483_v63 = vadd.f32 %v1482_v37, %v4055_v58  ;;  %v1518_v8 = vmul.f32 0.2, %v1432_v0 }
 0x2f7   : > { %2331 = vmatpush.bf16.msrb.mxu0 %v3023_v43 }
 0x2f8   : > { %v1521_v1 = vmul.f32 0.2, %v1483_v63  ;;  %v1550_v21 = vmax.f32 %v1432_v0, %v1518_v8 }
 0x2fa   : > { %v1553_v7 = vmax.f32 %v1483_v63, %v1521_v1 }
 0x2fb   : > { %v1433_v9 = vpop.f32.mrf.mxu3 }
 0x2fc   : > { %v4146_v10 = vpack.c.bf16 %v1553_v7, %v1551_v6  ;;  %v1434_v11 = vadd.f32 %v1433_v9, %v4064_v61  ;;  %v2876_v6 = vld [vmem:[%s4485_s6 + $0x58] sm:$0xf0] }
 0x2fd   : > { %v1485_v16 = vpop.f32.mrf.mxu0  ;;  %v2879_v7 = vor.u32 %v3123_v5, %v2876_v6  ;;  %v3115_v6 = vld [vmem:[%s4485_s6 + $0xc] sm:$0xf] }
 0x2fe   : > { %v1520_v19 = vmul.f32 0.2, %v1434_v11  ;;  %2051 = vmatmul.bf16.gmra.mxu2 %v4146_v10  ;;  %2149 = vmatmul.bf16.gmra.mxu0 %v4146_v10  ;;  %v1486_v25 = vadd.f32 %v1485_v16, %v4055_v58  ;;  %v3002_v16 = vld [vmem:[%s4485_s6 + $0x148] sm:$0xf] }
 0x2ff   : > { %2283 = vmatpush.bf16.msrb.mxu3 %v2879_v7  ;;  %v3003_v20 = vor.u32 %v3157_v17, %v3002_v16  ;;  %v2844_v7 = vld [vmem:[%s4485_s6 + $0x18] sm:$0xf0]  ;;  %v3117_v16 = vld [vmem:[%s4485_s6 + $0x14] sm:$0xf0] }
 0x300   : > { %v1552_v22 = vmax.f32 %v1434_v11, %v1520_v19  ;;  %v1523_v31 = vmul.f32 0.2, %v1486_v25 }
 0x301   : > { %2234 = vmatpush.bf16.msrb.mxu2 %v3003_v20 }
 0x302   : > { %v4163_v23 = vpack.c.bf16 %v1552_v22, %v1550_v21  ;;  %v1555_v39 = vmax.f32 %v1486_v25, %v1523_v31  ;;  %v3125_v21 = vld [vmem:[%s4485_s6 + $0x54] sm:$0xf0]  ;;  %v3004_v31 = vld [vmem:[%s4485_s6 + $0x158] sm:$0xf0] }
 0x303   : > { %v1436_v28 = vpop.f32.mrf.mxu3  ;;  %v2875_v25 = vor.u32 %v3125_v21, %v2874_v18 }
 0x304   : > { %2002 = vmatmul.bf16.gmra.mxu1 %v4163_v23  ;;  %2100 = vmatmul.bf16.gmra.mxu3 %v4163_v23  ;;  %v1437_v33 = vadd.f32 %v1436_v28, %v4064_v61 }
 0x305   : > { %v1487_v30 = vpop.f32.mrf.mxu0  ;;  %2185 = vmatpush.bf16.msrb.mxu1 %v2875_v25  ;;  %v3147_v25 = vld [vmem:[%s4485_s6 + $0x10c] sm:$0xf] }
 0x306   : > { %v1488_v32 = vadd.f32 %v1487_v30, %v4055_v58  ;;  %v1522_v42 = vmul.f32 0.2, %v1437_v33  ;;  %v3155_v30 = vld [vmem:[%s4485_s6 + $0x14c] sm:$0xf] }
 0x308   : > { %v1525_v35 = vmul.f32 0.2, %v1488_v32  ;;  %v1554_v34 = vmax.f32 %v1437_v33, %v1522_v42  ;;  %v3007_v33 = vor.u32 %v3155_v30, %v3004_v31  ;;  %v2860_v42 = vld [vmem:[%s4485_s6 + $0x38] sm:$0xf0] }
 0x30a   : > { %v1557_v41 = vmax.f32 %v1488_v32, %v1525_v35  ;;  %2332 = vmatpush.bf16.msrb.mxu0 %v3007_v33 }
 0x30b   : > { %v1438_v44 = vpop.f32.mrf.mxu3 }
 0x30c   : > { %v4182_v46 = vpack.c.bf16 %v1557_v41, %v1555_v39  ;;  %v1439_v47 = vadd.f32 %v1438_v44, %v4064_v61  ;;  %v3119_v41 = vld [vmem:[%s4485_s6 + $0x2c] sm:$0xf] }
 0x30d   : > { %v1490_v51 = vpop.f32.mrf.mxu0  ;;  %v2863_v44 = vor.u32 %v3119_v41, %v2860_v42 }
 0x30e   : > { %v1524_v54 = vmul.f32 0.2, %v1439_v47  ;;  %2056 = vmatmul.bf16.gmra.mxu2 %v4182_v46  ;;  %2154 = vmatmul.bf16.gmra.mxu0 %v4182_v46  ;;  %v1491_v59 = vadd.f32 %v1490_v51, %v4055_v58 }
 0x30f   : > { %2284 = vmatpush.bf16.msrb.mxu3 %v2863_v44 }
 0x310   : > { %v1556_v57 = vmax.f32 %v1439_v47, %v1524_v54  ;;  %v1527_v0 = vmul.f32 0.2, %v1491_v59  ;;  %v3153_v54 = vld [vmem:[%s4485_s6 + $0x134] sm:$0xf0] }
 0x312   : > { %v4199_v62 = vpack.c.bf16 %v1556_v57, %v1554_v34  ;;  %v1559_v8 = vmax.f32 %v1491_v59, %v1527_v0  ;;  %v2987_v57 = vor.u32 %v3153_v54, %v2986_v53  ;;  %v3121_v59 = vld [vmem:[%s4485_s6 + $0x34] sm:$0xf0] }
 0x313   : > { %v1441_v37 = vpop.f32.mrf.mxu3  ;;  %v2859_v60 = vor.u32 %v3121_v59, %v2858_v55 }
 0x314   : > { %2007 = vmatmul.bf16.gmra.mxu1 %v4199_v62  ;;  %2105 = vmatmul.bf16.gmra.mxu3 %v4199_v62  ;;  %v1442_v2 = vadd.f32 %v1441_v37, %v4064_v61 }
 0x315   : > { %v1492_v63 = vpop.f32.mrf.mxu0  ;;  %2235 = vmatpush.bf16.msrb.mxu2 %v2987_v57  ;;  %2186 = vmatpush.bf16.msrb.mxu1 %v2859_v60 }
 0x316   : > { %v1493_v1 = vadd.f32 %v1492_v63, %v4055_v58  ;;  %v1526_v11 = vmul.f32 0.2, %v1442_v2 }
 0x318   : > { %v1529_v3 = vmul.f32 0.2, %v1493_v1  ;;  %v1558_v26 = vmax.f32 %v1442_v2, %v1526_v11  ;;  %v2988_v2 = vld [vmem:[%s4485_s6 + $0x138] sm:$0xf0]  ;;  %v2847_v11 = vor.u32 %v3115_v6, %v2844_v7 }
 0x31a   : > { %v1561_v9 = vmax.f32 %v1493_v1, %v1529_v3  ;;  %v3151_v1 = vld [vmem:[%s4485_s6 + $0x12c] sm:$0xf]  ;;  %2285 = vmatpush.bf16.msrb.mxu3 %v2847_v11 }
 0x31b   : > { %v1443_v13 = vpop.f32.mrf.mxu3  ;;  %v2991_v5 = vor.u32 %v3151_v1, %v2988_v2 }
 0x31c   : > { %v4218_v14 = vpack.c.bf16 %v1561_v9, %v1559_v8  ;;  %v1444_v15 = vadd.f32 %v1443_v13, %v4064_v61  ;;  %v2970_v8 = vld [vmem:[%s4485_s6 + $0x108] sm:$0xf]  ;;  %v3149_v13 = vld [vmem:[%s4485_s6 + $0x114] sm:$0xf0] }
 0x31d   : > { %v1495_v19 = vpop.f32.mrf.mxu0  ;;  %2333 = vmatpush.bf16.msrb.mxu0 %v2991_v5 }
 0x31e   : > { %v1528_v22 = vmul.f32 0.2, %v1444_v15  ;;  %2061 = vmatmul.bf16.gmra.mxu2 %v4218_v14  ;;  %2159 = vmatmul.bf16.gmra.mxu0 %v4218_v14  ;;  %v1496_v29 = vadd.f32 %v1495_v19, %v4055_v58  ;;  %v2971_v19 = vor.u32 %v3149_v13, %v2970_v8 }
 0x320   : > { %v1560_v27 = vmax.f32 %v1444_v15, %v1528_v22  ;;  %v1531_v4 = vmul.f32 0.2, %v1496_v29  ;;  %v2842_v15 = vld [vmem:[%s4485_s6 + $0x8] sm:$0xf]  ;;  %2236 = vmatpush.bf16.msrb.mxu2 %v2971_v19 }
 0x321   : > { %v2843_v20 = vor.u32 %v3117_v16, %v2842_v15 }
 0x322   : > { %v4235_v28 = vpack.c.bf16 %v1560_v27, %v1558_v26  ;;  %v1563_v47 = vmax.f32 %v1496_v29, %v1531_v4  ;;  %v2972_v26 = vld [vmem:[%s4485_s6 + $0x118] sm:$0xf0] }
 0x323   : > { %v1446_v32 = vpop.f32.mrf.mxu3  ;;  %2187 = vmatpush.bf16.msrb.mxu1 %v2843_v20  ;;  %v2975_v27 = vor.u32 %v3147_v25, %v2972_v26 }
 0x324   : > { %2012 = vmatmul.bf16.gmra.mxu1 %v4235_v28  ;;  %2110 = vmatmul.bf16.gmra.mxu3 %v4235_v28  ;;  %v1447_v38 = vadd.f32 %v1446_v32, %v4064_v61 }
 0x325   : > { %v1497_v35 = vpop.f32.mrf.mxu0  ;;  %2334 = vmatpush.bf16.msrb.mxu0 %v2975_v27 }
 0x326   : > { %v1498_v36 = vadd.f32 %v1497_v35, %v4055_v58  ;;  %v1530_v49 = vmul.f32 0.2, %v1447_v38 }
 0x328   : > { %v1533_v39 = vmul.f32 0.2, %v1498_v36  ;;  %v1562_v37 = vmax.f32 %v1447_v38, %v1530_v49 }
 0x32a   : > { %v1565_v48 = vmax.f32 %v1498_v36, %v1533_v39 }
 0x32b   : > { %v1448_v50 = vpop.f32.mrf.mxu3 }
 0x32c   : > { %v4254_v51 = vpack.c.bf16 %v1565_v48, %v1563_v47  ;;  %v1449_v52 = vadd.f32 %v1448_v50, %v4064_v61 }
 0x32d   : > { %v1500_v34 = vpop.f32.mrf.mxu0 }
 0x32e   : > { %v1532_v40 = vmul.f32 0.2, %v1449_v52  ;;  %2066 = vmatmul.bf16.gmra.mxu2 %v4254_v51  ;;  %2164 = vmatmul.bf16.gmra.mxu0 %v4254_v51  ;;  %v1501_v0 = vadd.f32 %v1500_v34, %v4055_v58 }
 0x330   : > { %v1564_v43 = vmax.f32 %v1449_v52, %v1532_v40  ;;  %v1535_v17 = vmul.f32 0.2, %v1501_v0 }
 0x332   : > { %v4271_v63 = vpack.c.bf16 %v1564_v43, %v1562_v37  ;;  %v1567_v29 = vmax.f32 %v1501_v0, %v1535_v17  ;;  %v4332_v0 = vld [vmem:[%s4491_s12] sm:$0xf] }
 0x333   : > { %v1451_v3 = vpop.f32.mrf.mxu3  ;;  %v4343_v7 = vperm.slane %v4332_v0, 1 }
 0x334   : > { %2017 = vmatmul.bf16.gmra.mxu1 %v4271_v63  ;;  %2115 = vmatmul.bf16.gmra.mxu3 %v4271_v63  ;;  %v1452_v21 = vadd.f32 %v1451_v3, %v4064_v61 }
 0x335   : > { %v1502_v9 = vpop.f32.mrf.mxu0 }
 0x336   : > { %v1503_v18 = vadd.f32 %v1502_v9, %v4055_v58  ;;  %v1534_v32 = vmul.f32 0.2, %v1452_v21 }
 0x338   : > { %v1537_v22 = vmul.f32 0.2, %v1503_v18  ;;  %v1566_v38 = vmax.f32 %v1452_v21, %v1534_v32 }
 0x33a   : > { %v1569_v30 = vmax.f32 %v1503_v18, %v1537_v22 }
 0x33b   : > { %v1453_v31 = vpop.f32.mrf.mxu3 }
 0x33c   : > { %v4308_v33 = vpack.c.bf16 %v1569_v30, %v1567_v29  ;;  %v1454_v35 = vadd.f32 %v1453_v31, %v4064_v61 }
 0x33d   : > { %v1505_v4 = vpop.f32.mrf.mxu0 }
 0x33e   : > { %v1536_v36 = vmul.f32 0.2, %v1454_v35  ;;  %2071 = vmatmul.bf16.gmra.mxu2 %v4308_v33  ;;  %2169 = vmatmul.bf16.gmra.mxu0 %v4308_v33  ;;  %v1506_v42 = vadd.f32 %v1505_v4, %v4055_v58 }
 0x340   : > { %v1568_v39 = vmax.f32 %v1454_v35, %v1536_v36  ;;  %v1539_v48 = vmul.f32 0.2, %v1506_v42 }
 0x342   : > { %v4313_v41 = vpack.c.bf16 %v1568_v39, %v1566_v38  ;;  %v1571_v53 = vmax.f32 %v1506_v42, %v1539_v48 }
 0x343   : > { %v1456_v44 = vpop.f32.mrf.mxu3 }
 0x344   : > { %2022 = vmatmul.bf16.gmra.mxu1 %v4313_v41  ;;  %2120 = vmatmul.bf16.gmra.mxu3 %v4313_v41  ;;  %v1457_v50 = vadd.f32 %v1456_v44, %v4064_v61 }
 0x345   : > { %v1507_v47 = vpop.f32.mrf.mxu0 }
 0x346   : > { %v1508_v49 = vadd.f32 %v1507_v47, %v4055_v58  ;;  %v1538_v34 = vmul.f32 0.2, %v1457_v50 }
 0x348   : > { %v1541_v52 = vmul.f32 0.2, %v1508_v49  ;;  %v1570_v60 = vmax.f32 %v1457_v50, %v1538_v34 }
 0x34a   : > { %v1573_v54 = vmax.f32 %v1508_v49, %v1541_v52 }
 0x34b   : > { %v1458_v55 = vpop.f32.mrf.mxu3 }
 0x34c   : > { %v4320_v57 = vpack.c.bf16 %v1573_v54, %v1571_v53  ;;  %v1459_v59 = vadd.f32 %v1458_v55, %v4064_v61  ;;  %v4337_v61 = vperm.slane %v4332_v0, 0 }
 0x34e   : > { %v1540_v40 = vmul.f32 0.2, %v1459_v59  ;;  %2076 = vmatmul.bf16.gmra.mxu2 %v4320_v57  ;;  %2174 = vmatmul.bf16.gmra.mxu0 %v4320_v57 }
 0x350   : > { %v1572_v37 = vmax.f32 %v1459_v59, %v1540_v40 }
 0x352   : > { %v4325_v43 = vpack.c.bf16 %v1572_v37, %v1570_v60 }
 0x354   : > { %2027 = vmatmul.bf16.gmra.mxu1 %v4325_v43  ;;  %2125 = vmatmul.bf16.gmra.mxu3 %v4325_v43 }
 0x35b   : > { %v2140_v58 = vpop.f32.mrf.mxu0 }
 0x35e   : > { %2237 = vmatmul.bf16.vlgmr.msrb.gmra.mxu2 %v4074_v12  ;;  %2335 = vmatmul.bf16.vlgmr.msrb.gmra.mxu0 %v4074_v12 }
 0x361   : > { %v1993_v1 = vpop.f32.mrf.mxu1  ;;  %v2042_v2 = vpop.f32.mrf.mxu2 }
 0x362   : > { %v1994_v3 = vadd.f32 %v1993_v1, %v4337_v61 }
 0x363   : > { %v2142_v5 = vpop.f32.mrf.mxu0 }
 0x364   : > { %v2043_v6 = vadd.f32 %v2042_v2, %v1994_v3  ;;  %2188 = vmatmul.bf16.vlgmr.msrb.gmra.mxu1 %v4091_v24  ;;  %2286 = vmatmul.bf16.vlgmr.msrb.gmra.mxu3 %v4091_v24 }
 0x366   : > { %v2376_v17 = vmul.f32 0.2, %v2043_v6 }
 0x367   : > { %v2091_v8 = vpop.f32.mrf.mxu3 }
 0x368   : > { %v2092_v9 = vadd.f32 %v2091_v8, %v4343_v7  ;;  %v2440_v20 = vmax.f32 %v2043_v6, %v2376_v17 }
 0x369   : > { %v1995_v12 = vpop.f32.mrf.mxu1  ;;  %v2044_v11 = vpop.f32.mrf.mxu2 }
 0x36a   : > { %v2141_v13 = vadd.f32 %v2140_v58, %v2092_v9  ;;  %v1996_v15 = vadd.f32 %v1995_v12, %v4337_v61 }
 0x36b   : > { %v2145_v16 = vpop.f32.mrf.mxu0 }
 0x36c   : > { %v2045_v18 = vadd.f32 %v2044_v11, %v1996_v15  ;;  %v2377_v27 = vmul.f32 0.2, %v2141_v13 }
 0x36e   : > { %v2380_v19 = vmul.f32 0.2, %v2045_v18  ;;  %2242 = vmatmul.bf16.gmra.mxu2 %v4110_v45  ;;  %2340 = vmatmul.bf16.gmra.mxu0 %v4110_v45  ;;  %v2441_v45 = vmax.f32 %v2141_v13, %v2377_v27 }
 0x36f   : > { %v2093_v24 = vpop.f32.mrf.mxu3 }
 0x370   : > { %v2444_v21 = vmax.f32 %v2045_v18, %v2380_v19  ;;  %v2094_v22 = vadd.f32 %v2093_v24, %v4343_v7 }
 0x371   : > { %v1998_v25 = vpop.f32.mrf.mxu1  ;;  %v2047_v26 = vpop.f32.mrf.mxu2 }
 0x372   : > { %v2504_v29 = vmax.f32 %v2440_v20, %v2444_v21  ;;  %v2143_v30 = vadd.f32 %v2142_v5, %v2094_v22  ;;  %v1999_v31 = vadd.f32 %v1998_v25, %v4337_v61 }
 0x373   : > { %v2147_v32 = vpop.f32.mrf.mxu0 }
 0x374   : > { %v2381_v35 = vmul.f32 0.2, %v2143_v30  ;;  %v2048_v4 = vadd.f32 %v2047_v26, %v1999_v31  ;;  %2193 = vmatmul.bf16.gmra.mxu1 %v4127_v56  ;;  %2291 = vmatmul.bf16.gmra.mxu3 %v4127_v56 }
 0x376   : > { %v2445_v36 = vmax.f32 %v2143_v30, %v2381_v35  ;;  %v2384_v38 = vmul.f32 0.2, %v2048_v4 }
 0x377   : > { %v2096_v39 = vpop.f32.mrf.mxu3 }
 0x378   : > { %v2525_v42 = vmax.f32 %v2441_v45, %v2445_v36  ;;  %v2448_v44 = vmax.f32 %v2048_v4, %v2384_v38  ;;  %v2097_v47 = vadd.f32 %v2096_v39, %v4343_v7 }
 0x379   : > { %v2000_v48 = vpop.f32.mrf.mxu1  ;;  %v2049_v49 = vpop.f32.mrf.mxu2 }
 0x37a   : > { %v2505_v50 = vmax.f32 %v2504_v29, %v2448_v44  ;;  %v2146_v52 = vadd.f32 %v2145_v16, %v2097_v47  ;;  %v2001_v53 = vadd.f32 %v2000_v48, %v4337_v61 }
 0x37b   : > { %v2150_v54 = vpop.f32.mrf.mxu0 }
 0x37c   : > { %v2385_v55 = vmul.f32 0.2, %v2146_v52  ;;  %v2050_v34 = vadd.f32 %v2049_v49, %v2001_v53 }
 0x37e   : > { %v2449_v59 = vmax.f32 %v2146_v52, %v2385_v55  ;;  %v2388_v40 = vmul.f32 0.2, %v2050_v34  ;;  %2247 = vmatmul.bf16.gmra.mxu2 %v4146_v10  ;;  %2345 = vmatmul.bf16.gmra.mxu0 %v4146_v10 }
 0x37f   : > { %v2098_v56 = vpop.f32.mrf.mxu3 }
 0x380   : > { %v2526_v60 = vmax.f32 %v2525_v42, %v2449_v59  ;;  %v2452_v37 = vmax.f32 %v2050_v34, %v2388_v40  ;;  %v2099_v58 = vadd.f32 %v2098_v56, %v4343_v7 }
 0x381   : > { %v2003_v1 = vpop.f32.mrf.mxu1  ;;  %v2052_v2 = vpop.f32.mrf.mxu2 }
 0x382   : > { %v2506_v3 = vmax.f32 %v2505_v50, %v2452_v37  ;;  %v2148_v5 = vadd.f32 %v2147_v32, %v2099_v58  ;;  %v2004_v6 = vadd.f32 %v2003_v1, %v4337_v61 }
 0x383   : > { %v2152_v8 = vpop.f32.mrf.mxu0 }
 0x384   : > { %v2389_v9 = vmul.f32 0.2, %v2148_v5  ;;  %v2053_v12 = vadd.f32 %v2052_v2, %v2004_v6  ;;  %2198 = vmatmul.bf16.gmra.mxu1 %v4163_v23  ;;  %2296 = vmatmul.bf16.gmra.mxu3 %v4163_v23 }
 0x386   : > { %v2453_v11 = vmax.f32 %v2148_v5, %v2389_v9  ;;  %v2392_v10 = vmul.f32 0.2, %v2053_v12 }
 0x387   : > { %v2101_v13 = vpop.f32.mrf.mxu3 }
 0x388   : > { %v2527_v15 = vmax.f32 %v2526_v60, %v2453_v11  ;;  %v2456_v16 = vmax.f32 %v2053_v12, %v2392_v10  ;;  %v2102_v17 = vadd.f32 %v2101_v13, %v4343_v7 }
 0x389   : > { %v2005_v18 = vpop.f32.mrf.mxu1  ;;  %v2054_v19 = vpop.f32.mrf.mxu2 }
 0x38a   : > { %v2507_v24 = vmax.f32 %v2506_v3, %v2456_v16  ;;  %v2151_v20 = vadd.f32 %v2150_v54, %v2102_v17  ;;  %v2006_v21 = vadd.f32 %v2005_v18, %v4337_v61 }
 0x38b   : > { %v2155_v22 = vpop.f32.mrf.mxu0 }
 0x38c   : > { %v2393_v25 = vmul.f32 0.2, %v2151_v20  ;;  %v2055_v26 = vadd.f32 %v2054_v19, %v2006_v21 }
 0x38e   : > { %v2457_v27 = vmax.f32 %v2151_v20, %v2393_v25  ;;  %v2396_v29 = vmul.f32 0.2, %v2055_v26  ;;  %2252 = vmatmul.bf16.gmra.mxu2 %v4182_v46  ;;  %2350 = vmatmul.bf16.gmra.mxu0 %v4182_v46 }
 0x38f   : > { %v2103_v23 = vpop.f32.mrf.mxu3 }
 0x390   : > { %v2528_v30 = vmax.f32 %v2527_v15, %v2457_v27  ;;  %v2460_v31 = vmax.f32 %v2055_v26, %v2396_v29  ;;  %v2104_v32 = vadd.f32 %v2103_v23, %v4343_v7 }
 0x391   : > { %v2008_v35 = vpop.f32.mrf.mxu1  ;;  %v2057_v4 = vpop.f32.mrf.mxu2 }
 0x392   : > { %v2508_v45 = vmax.f32 %v2507_v24, %v2460_v31  ;;  %v2153_v36 = vadd.f32 %v2152_v8, %v2104_v32  ;;  %v2009_v38 = vadd.f32 %v2008_v35, %v4337_v61 }
 0x393   : > { %v2157_v39 = vpop.f32.mrf.mxu0 }
 0x394   : > { %v2397_v42 = vmul.f32 0.2, %v2153_v36  ;;  %v2058_v44 = vadd.f32 %v2057_v4, %v2009_v38  ;;  %2203 = vmatmul.bf16.gmra.mxu1 %v4199_v62  ;;  %2301 = vmatmul.bf16.gmra.mxu3 %v4199_v62 }
 0x396   : > { %v2461_v47 = vmax.f32 %v2153_v36, %v2397_v42  ;;  %v2400_v46 = vmul.f32 0.2, %v2058_v44 }
 0x397   : > { %v2106_v48 = vpop.f32.mrf.mxu3 }
 0x398   : > { %v2529_v49 = vmax.f32 %v2528_v30, %v2461_v47  ;;  %v2464_v50 = vmax.f32 %v2058_v44, %v2400_v46  ;;  %v2107_v52 = vadd.f32 %v2106_v48, %v4343_v7 }
 0x399   : > { %v2010_v53 = vpop.f32.mrf.mxu1  ;;  %v2059_v54 = vpop.f32.mrf.mxu2 }
 0x39a   : > { %v2509_v55 = vmax.f32 %v2508_v45, %v2464_v50  ;;  %v2156_v34 = vadd.f32 %v2155_v22, %v2107_v52  ;;  %v2011_v59 = vadd.f32 %v2010_v53, %v4337_v61 }
 0x39b   : > { %v2160_v40 = vpop.f32.mrf.mxu0 }
 0x39c   : > { %v2401_v56 = vmul.f32 0.2, %v2156_v34  ;;  %v2060_v60 = vadd.f32 %v2059_v54, %v2011_v59 }
 0x39e   : > { %v2465_v37 = vmax.f32 %v2156_v34, %v2401_v56  ;;  %v2404_v58 = vmul.f32 0.2, %v2060_v60  ;;  %2257 = vmatmul.bf16.gmra.mxu2 %v4218_v14  ;;  %2355 = vmatmul.bf16.gmra.mxu0 %v4218_v14 }
 0x39f   : > { %v2108_v62 = vpop.f32.mrf.mxu3 }
 0x3a0   : > { %v2530_v1 = vmax.f32 %v2529_v49, %v2465_v37  ;;  %v2468_v2 = vmax.f32 %v2060_v60, %v2404_v58  ;;  %v2109_v3 = vadd.f32 %v2108_v62, %v4343_v7 }
 0x3a1   : > { %v2013_v5 = vpop.f32.mrf.mxu1  ;;  %v2062_v6 = vpop.f32.mrf.mxu2 }
 0x3a2   : > { %v2510_v8 = vmax.f32 %v2509_v55, %v2468_v2  ;;  %v2158_v9 = vadd.f32 %v2157_v39, %v2109_v3  ;;  %v2014_v12 = vadd.f32 %v2013_v5, %v4337_v61 }
 0x3a3   : > { %v2162_v11 = vpop.f32.mrf.mxu0 }
 0x3a4   : > { %v2405_v10 = vmul.f32 0.2, %v2158_v9  ;;  %v2063_v13 = vadd.f32 %v2062_v6, %v2014_v12  ;;  %2208 = vmatmul.bf16.gmra.mxu1 %v4235_v28  ;;  %2306 = vmatmul.bf16.gmra.mxu3 %v4235_v28 }
 0x3a6   : > { %v2469_v15 = vmax.f32 %v2158_v9, %v2405_v10  ;;  %v2408_v14 = vmul.f32 0.2, %v2063_v13 }
 0x3a7   : > { %v2111_v16 = vpop.f32.mrf.mxu3 }
 0x3a8   : > { %v2531_v17 = vmax.f32 %v2530_v1, %v2469_v15  ;;  %v2472_v18 = vmax.f32 %v2063_v13, %v2408_v14  ;;  %v2112_v19 = vadd.f32 %v2111_v16, %v4343_v7 }
 0x3a9   : > { %v2015_v24 = vpop.f32.mrf.mxu1  ;;  %v2064_v20 = vpop.f32.mrf.mxu2 }
 0x3aa   : > { %v2511_v21 = vmax.f32 %v2510_v8, %v2472_v18  ;;  %v2161_v22 = vadd.f32 %v2160_v40, %v2112_v19  ;;  %v2016_v25 = vadd.f32 %v2015_v24, %v4337_v61 }
 0x3ab   : > { %v2165_v26 = vpop.f32.mrf.mxu0 }
 0x3ac   : > { %v2409_v27 = vmul.f32 0.2, %v2161_v22  ;;  %v2065_v29 = vadd.f32 %v2064_v20, %v2016_v25 }
 0x3ae   : > { %v2473_v23 = vmax.f32 %v2161_v22, %v2409_v27  ;;  %v2412_v30 = vmul.f32 0.2, %v2065_v29  ;;  %2262 = vmatmul.bf16.gmra.mxu2 %v4254_v51  ;;  %2360 = vmatmul.bf16.gmra.mxu0 %v4254_v51 }
 0x3af   : > { %v2113_v28 = vpop.f32.mrf.mxu3 }
 0x3b0   : > { %v2532_v31 = vmax.f32 %v2531_v17, %v2473_v23  ;;  %v2476_v32 = vmax.f32 %v2065_v29, %v2412_v30  ;;  %v2114_v35 = vadd.f32 %v2113_v28, %v4343_v7 }
 0x3b1   : > { %v2018_v4 = vpop.f32.mrf.mxu1  ;;  %v2067_v45 = vpop.f32.mrf.mxu2 }
 0x3b2   : > { %v2512_v36 = vmax.f32 %v2511_v21, %v2476_v32  ;;  %v2163_v38 = vadd.f32 %v2162_v11, %v2114_v35  ;;  %v2019_v39 = vadd.f32 %v2018_v4, %v4337_v61 }
 0x3b3   : > { %v2167_v42 = vpop.f32.mrf.mxu0 }
 0x3b4   : > { %v2413_v44 = vmul.f32 0.2, %v2163_v38  ;;  %v2068_v47 = vadd.f32 %v2067_v45, %v2019_v39  ;;  %2213 = vmatmul.bf16.gmra.mxu1 %v4271_v63  ;;  %2311 = vmatmul.bf16.gmra.mxu3 %v4271_v63 }
 0x3b6   : > { %v2477_v46 = vmax.f32 %v2163_v38, %v2413_v44  ;;  %v2416_v51 = vmul.f32 0.2, %v2068_v47 }
 0x3b7   : > { %v2116_v48 = vpop.f32.mrf.mxu3 }
 0x3b8   : > { %v2533_v49 = vmax.f32 %v2532_v31, %v2477_v46  ;;  %v2480_v50 = vmax.f32 %v2068_v47, %v2416_v51  ;;  %v2117_v52 = vadd.f32 %v2116_v48, %v4343_v7 }
 0x3b9   : > { %v2020_v53 = vpop.f32.mrf.mxu1  ;;  %v2069_v54 = vpop.f32.mrf.mxu2 }
 0x3ba   : > { %v2513_v55 = vmax.f32 %v2512_v36, %v2480_v50  ;;  %v2166_v34 = vadd.f32 %v2165_v26, %v2117_v52  ;;  %v2021_v59 = vadd.f32 %v2020_v53, %v4337_v61 }
 0x3bb   : > { %v2170_v40 = vpop.f32.mrf.mxu0 }
 0x3bc   : > { %v2417_v56 = vmul.f32 0.2, %v2166_v34  ;;  %v2070_v60 = vadd.f32 %v2069_v54, %v2021_v59 }
 0x3be   : > { %v2481_v37 = vmax.f32 %v2166_v34, %v2417_v56  ;;  %v2420_v58 = vmul.f32 0.2, %v2070_v60  ;;  %2267 = vmatmul.bf16.gmra.mxu2 %v4308_v33  ;;  %2365 = vmatmul.bf16.gmra.mxu0 %v4308_v33 }
 0x3bf   : > { %v2118_v63 = vpop.f32.mrf.mxu3 }
 0x3c0   : > { %v2534_v62 = vmax.f32 %v2533_v49, %v2481_v37  ;;  %v2484_v1 = vmax.f32 %v2070_v60, %v2420_v58  ;;  %v2119_v2 = vadd.f32 %v2118_v63, %v4343_v7 }
 0x3c1   : > { %v2023_v3 = vpop.f32.mrf.mxu1  ;;  %v2072_v5 = vpop.f32.mrf.mxu2 }
 0x3c2   : > { %v2514_v6 = vmax.f32 %v2513_v55, %v2484_v1  ;;  %v2168_v8 = vadd.f32 %v2167_v42, %v2119_v2  ;;  %v2024_v9 = vadd.f32 %v2023_v3, %v4337_v61 }
 0x3c3   : > { %v2172_v12 = vpop.f32.mrf.mxu0 }
 0x3c4   : > { %v2421_v11 = vmul.f32 0.2, %v2168_v8  ;;  %v2073_v10 = vadd.f32 %v2072_v5, %v2024_v9  ;;  %2218 = vmatmul.bf16.gmra.mxu1 %v4313_v41  ;;  %2316 = vmatmul.bf16.gmra.mxu3 %v4313_v41  ;;  %v4409_v9 = vperm.slane %v4332_v0, 3 }
 0x3c6   : > { %v2485_v13 = vmax.f32 %v2168_v8, %v2421_v11  ;;  %v2424_v33 = vmul.f32 0.2, %v2073_v10 }
 0x3c7   : > { %v2121_v15 = vpop.f32.mrf.mxu3 }
 0x3c8   : > { %v2535_v14 = vmax.f32 %v2534_v62, %v2485_v13  ;;  %v2488_v16 = vmax.f32 %v2073_v10, %v2424_v33  ;;  %v2122_v17 = vadd.f32 %v2121_v15, %v4343_v7 }
 0x3c9   : > { %v2025_v18 = vpop.f32.mrf.mxu1  ;;  %v2074_v19 = vpop.f32.mrf.mxu2 }
 0x3ca   : > { %v2515_v24 = vmax.f32 %v2514_v6, %v2488_v16  ;;  %v2171_v20 = vadd.f32 %v2170_v40, %v2122_v17  ;;  %v2026_v21 = vadd.f32 %v2025_v18, %v4337_v61 }
 0x3cb   : > { %v2175_v22 = vpop.f32.mrf.mxu0 }
 0x3cc   : > { %v2425_v25 = vmul.f32 0.2, %v2171_v20  ;;  %v2075_v26 = vadd.f32 %v2074_v19, %v2026_v21 }
 0x3ce   : > { %v2489_v27 = vmax.f32 %v2171_v20, %v2425_v25  ;;  %v2428_v29 = vmul.f32 0.2, %v2075_v26  ;;  %2272 = vmatmul.bf16.gmra.mxu2 %v4320_v57  ;;  %2370 = vmatmul.bf16.gmra.mxu0 %v4320_v57 }
 0x3cf   : > { %v2123_v41 = vpop.f32.mrf.mxu3 }
 0x3d0   : > { %v2536_v23 = vmax.f32 %v2535_v14, %v2489_v27  ;;  %v2492_v30 = vmax.f32 %v2075_v26, %v2428_v29  ;;  %v2124_v28 = vadd.f32 %v2123_v41, %v4343_v7 }
 0x3d1   : > { %v2028_v31 = vpop.f32.mrf.mxu1  ;;  %v2077_v32 = vpop.f32.mrf.mxu2 }
 0x3d2   : > { %v2516_v35 = vmax.f32 %v2515_v24, %v2492_v30  ;;  %v2173_v4 = vadd.f32 %v2172_v12, %v2124_v28  ;;  %v2029_v45 = vadd.f32 %v2028_v31, %v4337_v61 }
 0x3d3   : > { %v2177_v36 = vpop.f32.mrf.mxu0 }
 0x3d4   : > { %v2429_v38 = vmul.f32 0.2, %v2173_v4  ;;  %v2078_v39 = vadd.f32 %v2077_v32, %v2029_v45  ;;  %2223 = vmatmul.bf16.gmra.mxu1 %v4325_v43  ;;  %2321 = vmatmul.bf16.gmra.mxu3 %v4325_v43  ;;  %v4404_v43 = vperm.slane %v4332_v0, 2 }
 0x3d6   : > { %v2493_v42 = vmax.f32 %v2173_v4, %v2429_v38  ;;  %v2432_v57 = vmul.f32 0.2, %v2078_v39 }
 0x3d7   : > { %v2126_v44 = vpop.f32.mrf.mxu3 }
 0x3d8   : > { %v2537_v47 = vmax.f32 %v2536_v23, %v2493_v42  ;;  %v2496_v46 = vmax.f32 %v2078_v39, %v2432_v57  ;;  %v2127_v51 = vadd.f32 %v2126_v44, %v4343_v7 }
 0x3d9   : > { %v2030_v48 = vpop.f32.mrf.mxu1  ;;  %v2079_v49 = vpop.f32.mrf.mxu2 }
 0x3da   : > { %v2517_v50 = vmax.f32 %v2516_v35, %v2496_v46  ;;  %v2176_v52 = vadd.f32 %v2175_v22, %v2127_v51  ;;  %v2031_v53 = vadd.f32 %v2030_v48, %v4337_v61 }
 0x3db   : > { %v2336_v54 = vpop.f32.mrf.mxu0 }
 0x3dc   : > { %v2433_v55 = vmul.f32 0.2, %v2176_v52  ;;  %v2080_v34 = vadd.f32 %v2079_v49, %v2031_v53 }
 0x3de   : > { %v2497_v59 = vmax.f32 %v2176_v52, %v2433_v55  ;;  %v2436_v40 = vmul.f32 0.2, %v2080_v34 }
 0x3df   : > { %v2128_v56 = vpop.f32.mrf.mxu3 }
 0x3e0   : > { %v2538_v60 = vmax.f32 %v2537_v47, %v2497_v59  ;;  %v2500_v37 = vmax.f32 %v2080_v34, %v2436_v40  ;;  %v2129_v58 = vadd.f32 %v2128_v56, %v4343_v7 }
 0x3e1   : > { %v2189_v63 = vpop.f32.mrf.mxu1  ;;  %v2238_v62 = vpop.f32.mrf.mxu2 }
 0x3e2   : > { %v2518_v1 = vmax.f32 %v2517_v50, %v2500_v37  ;;  %v2178_v2 = vadd.f32 %v2177_v36, %v2129_v58  ;;  %v2190_v3 = vadd.f32 %v2189_v63, %v4404_v43 }
 0x3e3   : > { %v2338_v61 = vpop.f32.mrf.mxu0 }
 0x3e4   : > { %v2519_v5 = vrot.slane %v2518_v1, 4  ;;  %v2437_v6 = vmul.f32 0.2, %v2178_v2  ;;  %v2239_v8 = vadd.f32 %v2238_v62, %v2190_v3 }
 0x3e6   : > { %v2520_v12 = vmax.f32 %v2518_v1, %v2519_v5  ;;  %v2501_v11 = vmax.f32 %v2178_v2, %v2437_v6  ;;  %v2378_v22 = vmul.f32 0.2, %v2239_v8 }
 0x3e7   : > { %v2287_v10 = vpop.f32.mrf.mxu3 }
 0x3e8   : > { %v2521_v13 = vrot.slane %v2520_v12, 2  ;;  %v2539_v33 = vmax.f32 %v2538_v60, %v2501_v11  ;;  %v2288_v7 = vadd.f32 %v2287_v10, %v4409_v9  ;;  %v2442_v23 = vmax.f32 %v2239_v8, %v2378_v22 }
 0x3e9   : > { %v2191_v15 = vpop.f32.mrf.mxu1  ;;  %v2240_v14 = vpop.f32.mrf.mxu2 }
 0x3ea   : > { %v2522_v16 = vmax.f32 %v2520_v12, %v2521_v13  ;;  %v2540_v17 = vrot.slane %v2539_v33, 4  ;;  %v2337_v18 = vadd.f32 %v2336_v54, %v2288_v7  ;;  %v2192_v19 = vadd.f32 %v2191_v15, %v4404_v43 }
 0x3eb   : > { %v2341_v24 = vpop.f32.mrf.mxu0 }
 0x3ec   : > { %v2523_v20 = vrot.slane %v2522_v16, 1  ;;  %v2541_v21 = vmax.f32 %v2539_v33, %v2540_v17  ;;  %v2241_v0 = vadd.f32 %v2240_v14, %v2192_v19  ;;  %v2379_v31 = vmul.f32 0.2, %v2337_v18 }
 0x3ee   : > { %v4413_v25 = vmax.f32 %v2522_v16, %v2523_v20  ;;  %v2542_v26 = vrot.slane %v2541_v21, 2  ;;  %v2382_v27 = vmul.f32 0.2, %v2241_v0  ;;  %v2443_v47 = vmax.f32 %v2337_v18, %v2379_v31 }
 0x3ef   : > { %v2289_v29 = vpop.f32.mrf.mxu3 }
 0x3f0   : > { %v2543_v41 = vmax.f32 %v2541_v21, %v2542_v26  ;;  %v2446_v30 = vmax.f32 %v2241_v0, %v2382_v27  ;;  %v2290_v28 = vadd.f32 %v2289_v29, %v4409_v9 }
 0x3f1   : > { %v2194_v32 = vpop.f32.mrf.mxu1  ;;  %v2243_v35 = vpop.f32.mrf.mxu2 }
 0x3f2   : > { %v2544_v4 = vrot.slane %v2543_v41, 1  ;;  %v2546_v45 = vmax.f32 %v2442_v23, %v2446_v30  ;;  %v2339_v36 = vadd.f32 %v2338_v61, %v2290_v28  ;;  %v2195_v38 = vadd.f32 %v2194_v32, %v4404_v43 }
 0x3f3   : > { %v2343_v39 = vpop.f32.mrf.mxu0 }
 0x3f4   : > { %v4417_v42 = vmax.f32 %v2543_v41, %v2544_v4  ;;  %v2383_v57 = vmul.f32 0.2, %v2339_v36  ;;  %v2244_v44 = vadd.f32 %v2243_v35, %v2195_v38 }
 0x3f6   : > { %v2447_v46 = vmax.f32 %v2339_v36, %v2383_v57  ;;  %v2386_v51 = vmul.f32 0.2, %v2244_v44 }
 0x3f7   : > { %v2292_v48 = vpop.f32.mrf.mxu3 }
 0x3f8   : > { %v2567_v49 = vmax.f32 %v2443_v47, %v2447_v46  ;;  %v2450_v50 = vmax.f32 %v2244_v44, %v2386_v51  ;;  %v2293_v52 = vadd.f32 %v2292_v48, %v4409_v9 }
 0x3f9   : > { %v2196_v53 = vpop.f32.mrf.mxu1  ;;  %v2245_v54 = vpop.f32.mrf.mxu2 }
 0x3fa   : > { %v2547_v55 = vmax.f32 %v2546_v45, %v2450_v50  ;;  %v2342_v34 = vadd.f32 %v2341_v24, %v2293_v52  ;;  %v2197_v59 = vadd.f32 %v2196_v53, %v4404_v43 }
 0x3fb   : > { %v2346_v40 = vpop.f32.mrf.mxu0 }
 0x3fc   : > { %v2387_v56 = vmul.f32 0.2, %v2342_v34  ;;  %v2246_v60 = vadd.f32 %v2245_v54, %v2197_v59 }
 0x3fe   : > { %v2451_v37 = vmax.f32 %v2342_v34, %v2387_v56  ;;  %v2390_v58 = vmul.f32 0.2, %v2246_v60 }
 0x3ff   : > { %v2294_v63 = vpop.f32.mrf.mxu3 }
 0x400   : > { %v2568_v62 = vmax.f32 %v2567_v49, %v2451_v37  ;;  %v2454_v1 = vmax.f32 %v2246_v60, %v2390_v58  ;;  %v2295_v2 = vadd.f32 %v2294_v63, %v4409_v9 }
 0x401   : > { %v2199_v3 = vpop.f32.mrf.mxu1  ;;  %v2248_v61 = vpop.f32.mrf.mxu2 }
 0x402   : > { %v2548_v5 = vmax.f32 %v2547_v55, %v2454_v1  ;;  %v2344_v6 = vadd.f32 %v2343_v39, %v2295_v2  ;;  %v2200_v8 = vadd.f32 %v2199_v3, %v4404_v43 }
 0x403   : > { %v2348_v12 = vpop.f32.mrf.mxu0 }
 0x404   : > { %v2391_v11 = vmul.f32 0.2, %v2344_v6  ;;  %v2249_v10 = vadd.f32 %v2248_v61, %v2200_v8 }
 0x406   : > { %v2455_v13 = vmax.f32 %v2344_v6, %v2391_v11  ;;  %v2394_v33 = vmul.f32 0.2, %v2249_v10 }
 0x407   : > { %v2297_v7 = vpop.f32.mrf.mxu3 }
 0x408   : > { %v2569_v15 = vmax.f32 %v2568_v62, %v2455_v13  ;;  %v2458_v14 = vmax.f32 %v2249_v10, %v2394_v33  ;;  %v2298_v16 = vadd.f32 %v2297_v7, %v4409_v9 }
 0x409   : > { %v2201_v17 = vpop.f32.mrf.mxu1  ;;  %v2250_v18 = vpop.f32.mrf.mxu2 }
 0x40a   : > { %v2549_v19 = vmax.f32 %v2548_v5, %v2458_v14  ;;  %v2347_v24 = vadd.f32 %v2346_v40, %v2298_v16  ;;  %v2202_v52 = vadd.f32 %v2201_v17, %v4404_v43 }
 0x40b   : > { %v2351_v20 = vpop.f32.mrf.mxu0 }
 0x40c   : > { %v2395_v21 = vmul.f32 0.2, %v2347_v24  ;;  %v2251_v54 = vadd.f32 %v2250_v18, %v2202_v52 }
 0x40e   : > { %v2459_v22 = vmax.f32 %v2347_v24, %v2395_v21  ;;  %v2398_v37 = vmul.f32 0.2, %v2251_v54 }
 0x40f   : > { %v2299_v0 = vpop.f32.mrf.mxu3 }
 0x410   : > { %v4424_v26 = vmax.f32 %v2569_v15, %v2459_v22  ;;  %v2300_v34 = vadd.f32 %v2299_v0, %v4409_v9  ;;  %v2462_v6 = vmax.f32 %v2251_v54, %v2398_v37 }
 0x411   : > { %v2204_v27 = vpop.f32.mrf.mxu1  ;;  %v2253_v29 = vpop.f32.mrf.mxu2 }
 0x412   : > { %v2205_v53 = vadd.f32 %v2204_v27, %v4404_v43  ;;  %v2349_v62 = vadd.f32 %v2348_v12, %v2300_v34  ;;  %v2550_v21 = vmax.f32 %v2549_v19, %v2462_v6 }
 0x413   : > { %v2353_v41 = vpop.f32.mrf.mxu0 }
 0x414   : > { %v2254_v60 = vadd.f32 %v2253_v29, %v2205_v53  ;;  %v2399_v13 = vmul.f32 0.2, %v2349_v62 }
 0x416   : > { %v2402_v61 = vmul.f32 0.2, %v2254_v60  ;;  %v2463_v29 = vmax.f32 %v2349_v62, %v2399_v13 }
 0x417   : > { %v2302_v23 = vpop.f32.mrf.mxu3 }
 0x418   : > { %v2303_v1 = vadd.f32 %v2302_v23, %v4409_v9  ;;  %v2466_v18 = vmax.f32 %v2254_v60, %v2402_v61  ;;  %v2571_v52 = vmax.f32 %v4424_v26, %v2463_v29 }
 0x419   : > { %v2206_v30 = vpop.f32.mrf.mxu1  ;;  %v2255_v28 = vpop.f32.mrf.mxu2 }
 0x41a   : > { %v2207_v59 = vadd.f32 %v2206_v30, %v4404_v43  ;;  %v2352_v33 = vadd.f32 %v2351_v20, %v2303_v1 }
 0x41b   : > { %v2356_v31 = vpop.f32.mrf.mxu0 }
 0x41c   : > { %v2256_v2 = vadd.f32 %v2255_v28, %v2207_v59  ;;  %v2403_v23 = vmul.f32 0.2, %v2352_v33 }
 0x41e   : > { %v2406_v7 = vmul.f32 0.2, %v2256_v2  ;;  %v2467_v53 = vmax.f32 %v2352_v33, %v2403_v23 }
 0x41f   : > { %v2304_v32 = vpop.f32.mrf.mxu3 }
 0x420   : > { %v2305_v5 = vadd.f32 %v2304_v32, %v4409_v9  ;;  %v2470_v30 = vmax.f32 %v2256_v2, %v2406_v7 }
 0x421   : > { %v2209_v35 = vpop.f32.mrf.mxu1  ;;  %v2258_v4 = vpop.f32.mrf.mxu2 }
 0x422   : > { %v2210_v58 = vadd.f32 %v2209_v35, %v4404_v43  ;;  %v2354_v24 = vadd.f32 %v2353_v41, %v2305_v5 }
 0x423   : > { %v2358_v45 = vpop.f32.mrf.mxu0 }
 0x424   : > { %v2259_v8 = vadd.f32 %v2258_v4, %v2210_v58 }
 0x426   : > { %v2410_v22 = vmul.f32 0.2, %v2259_v8 }
 0x427   : > { %v2307_v36 = vpop.f32.mrf.mxu3 }
 0x428   : > { %v2308_v15 = vadd.f32 %v2307_v36, %v4409_v9  ;;  %v2474_v19 = vmax.f32 %v2259_v8, %v2410_v22 }
 0x429   : > { %v2211_v38 = vpop.f32.mrf.mxu1  ;;  %v2260_v39 = vpop.f32.mrf.mxu2 }
 0x42a   : > { %v2212_v3 = vadd.f32 %v2211_v38, %v4404_v43  ;;  %v2357_v28 = vadd.f32 %v2356_v31, %v2308_v15  ;;  %v2551_v38 = vmax.f32 %v2550_v21, %v2466_v18 }
 0x42b   : > { %v4426_v57 = vpop.f32.mrf.mxu0 }
 0x42c   : > { %v2261_v14 = vadd.f32 %v2260_v39, %v2212_v3  ;;  %v2407_v39 = vmul.f32 0.2, %v2354_v24  ;;  %v2552_v54 = vmax.f32 %v2551_v38, %v2470_v30  ;;  %v2411_v34 = vmul.f32 0.2, %v2357_v28 }
 0x42d   : > { %v2572_v3 = vmax.f32 %v2571_v52, %v2467_v53 }
 0x42e   : > { %v2414_v32 = vmul.f32 0.2, %v2261_v14  ;;  %v2471_v37 = vmax.f32 %v2354_v24, %v2407_v39 }
 0x42f   : > { %v2309_v44 = vpop.f32.mrf.mxu3 }
 0x430   : > { %v2310_v0 = vadd.f32 %v2309_v44, %v4409_v9  ;;  %v2478_v59 = vmax.f32 %v2261_v14, %v2414_v32  ;;  %v2573_v33 = vmax.f32 %v2572_v3, %v2471_v37 }
 0x431   : > { %v2214_v47 = vpop.f32.mrf.mxu1  ;;  %v2263_v46 = vpop.f32.mrf.mxu2 }
 0x432   : > { %v2215_v11 = vadd.f32 %v2214_v47, %v4404_v43  ;;  %v2359_v47 = vadd.f32 %v2358_v45, %v2310_v0 }
 0x433   : > { %v4428_v48 = vpop.f32.mrf.mxu0 }
 0x434   : > { %v2264_v27 = vadd.f32 %v2263_v46, %v2215_v11  ;;  %v2415_v1 = vmul.f32 0.2, %v2359_v47 }
 0x436   : > { %v2479_v7 = vmax.f32 %v2359_v47, %v2415_v1 }
 0x437   : > { %v2312_v51 = vpop.f32.mrf.mxu3 }
 0x438   : > { %v2313_v35 = vadd.f32 %v2312_v51, %v4409_v9 }
 0x439   : > { %v2216_v49 = vpop.f32.mrf.mxu1  ;;  %v2265_v50 = vpop.f32.mrf.mxu2 }
 0x43a   : > { %v2217_v12 = vadd.f32 %v2216_v49, %v4404_v43  ;;  %v2418_v49 = vmul.f32 0.2, %v2264_v27  ;;  %v2362_v51 = vadd.f32 %v4426_v57, %v2313_v35  ;;  %v2475_v57 = vmax.f32 %v2357_v28, %v2411_v34 }
 0x43b   : > { %v4435_v63 = vpop.f32.mrf.mxu0 }
 0x43c   : > { %v2266_v4 = vadd.f32 %v2265_v50, %v2217_v12  ;;  %v2482_v2 = vmax.f32 %v2264_v27, %v2418_v49  ;;  %v2419_v8 = vmul.f32 0.2, %v2362_v51  ;;  %v2574_v21 = vmax.f32 %v2573_v33, %v2475_v57 }
 0x43e   : > { %v2422_v50 = vmul.f32 0.2, %v2266_v4  ;;  %v2483_v22 = vmax.f32 %v2362_v51, %v2419_v8 }
 0x43f   : > { %v2314_v55 = vpop.f32.mrf.mxu3 }
 0x440   : > { %v2315_v44 = vadd.f32 %v2314_v55, %v4409_v9  ;;  %v2553_v55 = vmax.f32 %v2552_v54, %v2474_v19  ;;  %v2486_v11 = vmax.f32 %v2266_v4, %v2422_v50 }
 0x441   : > { %v2219_v40 = vpop.f32.mrf.mxu1  ;;  %v2268_v56 = vpop.f32.mrf.mxu2 }
 0x442   : > { %v2220_v20 = vadd.f32 %v2219_v40, %v4404_v43  ;;  %v2364_v26 = vadd.f32 %v4428_v48, %v2315_v44  ;;  %v2554_v6 = vmax.f32 %v2553_v55, %v2478_v59 }
 0x443   : > { %v2368_v36 = vpop.f32.mrf.mxu0 }
 0x444   : > { %v2269_v31 = vadd.f32 %v2268_v56, %v2220_v20  ;;  %v2555_v15 = vmax.f32 %v2554_v6, %v2482_v2  ;;  %v2423_v14 = vmul.f32 0.2, %v2364_v26  ;;  %v2575_v20 = vmax.f32 %v2574_v21, %v2479_v7 }
 0x446   : > { %v2426_v56 = vmul.f32 0.2, %v2269_v31  ;;  %v2556_v0 = vmax.f32 %v2555_v15, %v2486_v11  ;;  %v2487_v28 = vmax.f32 %v2364_v26, %v2423_v14 }
 0x447   : > { %v2317_v10 = vpop.f32.mrf.mxu3 }
 0x448   : > { %v2318_v58 = vadd.f32 %v2317_v10, %v4409_v9 }
 0x449   : > { %v2221_v16 = vpop.f32.mrf.mxu1  ;;  %v2270_v17 = vpop.f32.mrf.mxu2 }
 0x44a   : > { %v2222_v41 = vadd.f32 %v2221_v16, %v4404_v43  ;;  %v2367_v13 = vadd.f32 %v4435_v63, %v2318_v58 }
 0x44b   : > { %v2371_v12 = vpop.f32.mrf.mxu0 }
 0x44c   : > { %v2271_v45 = vadd.f32 %v2270_v17, %v2222_v41  ;;  %v2490_v17 = vmax.f32 %v2269_v31, %v2426_v56  ;;  %v2427_v29 = vmul.f32 0.2, %v2367_v13 }
 0x44e   : > { %v2430_v10 = vmul.f32 0.2, %v2271_v45  ;;  %v2557_v35 = vmax.f32 %v2556_v0, %v2490_v17  ;;  %v2491_v41 = vmax.f32 %v2367_v13, %v2427_v29 }
 0x44f   : > { %v2319_v46 = vpop.f32.mrf.mxu3 }
 0x450   : > { %v2320_v61 = vadd.f32 %v2319_v46, %v4409_v9  ;;  %v2494_v23 = vmax.f32 %v2271_v45, %v2430_v10 }
 0x451   : > { %v2224_v40 = vpop.f32.mrf.mxu1  ;;  %v2273_v60 = vpop.f32.mrf.mxu2 }
 0x452   : > { %v2225_v62 = vadd.f32 %v2224_v40, %v4404_v43  ;;  %v2369_v48 = vadd.f32 %v2368_v36, %v2320_v61  ;;  %v2576_v36 = vmax.f32 %v2575_v20, %v2483_v22  ;;  %v2558_v19 = vmax.f32 %v2557_v35, %v2494_v23 }
 0x454   : > { %v2274_v5 = vadd.f32 %v2273_v60, %v2225_v62  ;;  %v2431_v4 = vmul.f32 0.2, %v2369_v48  ;;  %v2577_v44 = vmax.f32 %v2576_v36, %v2487_v28 }
 0x456   : > { %v2434_v18 = vmul.f32 0.2, %v2274_v5  ;;  %v2495_v52 = vmax.f32 %v2369_v48, %v2431_v4  ;;  %v2578_v34 = vmax.f32 %v2577_v44, %v2491_v41 }
 0x457   : > { %v2322_v16 = vpop.f32.mrf.mxu3 }
 0x458   : > { %v2323_v24 = vadd.f32 %v2322_v16, %v4409_v9  ;;  %v2498_v38 = vmax.f32 %v2274_v5, %v2434_v18  ;;  %v2579_v40 = vmax.f32 %v2578_v34, %v2495_v52 }
 0x459   : > { %v2226_v27 = vpop.f32.mrf.mxu1  ;;  %v2275_v32 = vpop.f32.mrf.mxu2 }
 0x45a   : > { %v2372_v30 = vadd.f32 %v2371_v12, %v2323_v24  ;;  %v2227_v63 = vadd.f32 %v2226_v27, %v4404_v43  ;;  %v2559_v53 = vmax.f32 %v2558_v19, %v2498_v38  ;;  %v2373_v43 = vpop.f32.mrf.mxu0 }
 0x45c   : > { %v2276_v39 = vadd.f32 %v2275_v32, %v2227_v63  ;;  %v2435_v47 = vmul.f32 0.2, %v2372_v30 }
 0x45e   : > { %v2438_v49 = vmul.f32 0.2, %v2276_v39  ;;  %v2499_v59 = vmax.f32 %v2372_v30, %v2435_v47 }
 0x45f   : > { %v2324_v46 = vpop.f32.mrf.mxu3 }
 0x460   : > { %v2502_v54 = vmax.f32 %v2276_v39, %v2438_v49  ;;  %v2325_v31 = vadd.f32 %v2324_v46, %v4409_v9  ;;  %v2580_v58 = vmax.f32 %v2579_v40, %v2499_v59 }
 0x462   : > { %v2560_v51 = vmax.f32 %v2559_v53, %v2502_v54  ;;  %v2374_v50 = vadd.f32 %v2373_v43, %v2325_v31 }
 0x464   : > { %v2561_v60 = vrot.slane %v2560_v51, 4  ;;  %v2439_v37 = vmul.f32 0.2, %v2374_v50 }
 0x466   : > { %v2562_v45 = vmax.f32 %v2560_v51, %v2561_v60  ;;  %v2503_v62 = vmax.f32 %v2374_v50, %v2439_v37 }
 0x468   : > { %v2563_v55 = vrot.slane %v2562_v45, 2  ;;  %v2581_v1 = vmax.f32 %v2580_v58, %v2503_v62 }
 0x46a   : > { %v2564_v2 = vmax.f32 %v2562_v45, %v2563_v55  ;;  %v2582_v26 = vrot.slane %v2581_v1, 4 }
 0x46c   : > { %v2565_v3 = vrot.slane %v2564_v2, 1  ;;  %v2583_v56 = vmax.f32 %v2581_v1, %v2582_v26 }
 0x46e   : > { %v2566_v61 = vmax.f32 %v2564_v2, %v2565_v3  ;;  %v2584_v5 = vrot.slane %v2583_v56, 2 }
 0x470   : > { %v2585_v9 = vmax.f32 %v2583_v56, %v2584_v5  ;;  %2591 = sbr.rel (%p3088_p7) target bundleno = 1145 (0x479), region = 76 }
 0x472   : > { %v2586_v57 = vrot.slane %v2585_v9, 1 }
 0x474   : > { %v2587_v6 = vmax.f32 %v2585_v9, %v2586_v57 }
 0x475   : > { %v2592_v8 = vlaneseq  ;;  %v3409_v11 = vmov -inf  }
 0x477   : > { %vm2594_vm3 = vcmp.lt.s32.totalorder %v2592_v8, 512 }
 0x478   : > { %2596 = vst.msk [vmem:[%s3519_s21] sm:$0xf] %vm2594_vm3, %v3409_v11 }
 0x479 PF: > { %v2602_v13 = vrot.slane %v4417_v42, 7  ;;  %v2603_v10 = vrot.slane %v2566_v61, 6  ;;  %v2604_v33 = vrot.slane %v2587_v6, 5  ;;  %vm2605_vm4 = vcmask 1040384  }
 0x47a   : > { %vm2607_vm5 = vcmask 1042434   ;;  %vm2609_vm6 = vcmask 1041408   ;;  %v2613_v15 = vlaneseq }
 0x47b   : > { %v2606_v14 = vsel %vm2605_vm4, %v4413_v25, %v2602_v13  ;;  %v2608_v12 = vsel %vm2607_vm5, %v2603_v10, %v2604_v33 }
 0x47c   : > { %v2610_v16 = vsel %vm2609_vm6, %v2606_v14, %v2608_v12  ;;  %vm2615_vm7 = vcmp.lt.s32.totalorder %v2613_v15, 512 }
 0x47f   : > { %v2597_v7 = vld [vmem:[%s3519_s21] sm:$0xf] }
 0x480   : > { %v2612_v17 = vmax.f32 %v2597_v7, %v2610_v16 }
 0x482   : > { %2617 = vst.msk [vmem:[%s3519_s21] sm:$0xf] %vm2615_vm7, %v2612_v17 }
 0x483 PF: > { %s23_s29 = sadd.s32 1, %s3404_s29   ;;  %s4494_s20 = sld [smem:[#allocation2_spill]] }
 0x484   : > { %p20_p8 = scmp.ge.s32.totalorder %s23_s29, 10   ;;  %s4495_s25 = smov %s3396_s27 }
 0x485   : > { %s4496_s26 = smov %s3400_s28  ;;  %s4497_s27 = smov %s4500_s30 }
 0x486   :  { %22 = sbr.rel (!%p20_p8) target bundleno = 3 (0x3), region = 106 }
 0x489   : > { %s4498_s28 = smov %s4494_s20 }

</bundles_post_ra>
